<compile_context>
chip_gen: v6e
topology: v6e:2x2x1
jax: 0.10.0
libtpu: 0.0.40
codegen_flags: <defaults>
</compile_context>

<pallas_src>
import functools

import jax
import jax.numpy as jnp
import numpy as np
from jax.experimental import pallas as pl
from jax.experimental.pallas import tpu as pltpu


def _silu(x):
    return x * jax.nn.sigmoid(x)


def _scale_norm_bf16(x, scala, eps):
    ms = jnp.mean(x * x, axis=-1, keepdims=True)
    return (x * jax.lax.rsqrt(ms + eps) * scala).astype(jnp.bfloat16)


def _rope(t, sin_signed, cos_full, half):
    # rotate-half via a lane roll (shift == half swaps the two halves), keeping the
    # whole computation lane-aligned:  out = t*[cos,cos] + roll(t,half)*[-sin,sin].
    return t * cos_full + pltpu.roll(t, half, 1) * sin_signed


# ---------------------------------------------------------------------------
# Pass 1: accumulate the global (non-causal) lin_kv per batch element.
# ---------------------------------------------------------------------------
def lin_kv_kernel(x_ref, scala_ref, wv_ref, bv_ref, wb_ref, bb_ref, aff_ref,
                  sin_ref, cos_ref, kv_ref, *, chunk_size, eps, half):
    @pl.when(pl.program_id(1) == 0)
    def _():
        kv_ref[...] = jnp.zeros_like(kv_ref)

    x = x_ref[0]                                             # (TILE_T, D) f32
    xn = _scale_norm_bf16(x, scala_ref[...], eps)            # bf16 for MXU

    v = _silu(jnp.dot(xn, wv_ref[...], preferred_element_type=jnp.float32) + bv_ref[...])
    base = _silu(jnp.dot(xn, wb_ref[...], preferred_element_type=jnp.float32) + bb_ref[...])

    aff = aff_ref[...]                                       # (8, S) packed affine params
    lin_k = _rope(base * aff[6:7, :] + aff[7:8, :], sin_ref[...], cos_ref[...], half)

    kv = jnp.einsum('tk,te->ke', lin_k.astype(jnp.bfloat16), v.astype(jnp.bfloat16),
                    preferred_element_type=jnp.float32)      # (S, E)
    kv_ref[0] += kv * (1.0 / chunk_size)


# ---------------------------------------------------------------------------
# Pass 2: per-tile quadratic + linear attention, gating and output projection.
# ---------------------------------------------------------------------------
def flash_out_kernel(x_ref, scala_ref, wu_ref, bu_ref, wv_ref, bv_ref, wb_ref, bb_ref,
                     aff_ref, sin_ref, cos_ref, biasq_ref, kv_ref, wo_ref, bo_ref,
                     o_ref, *, chunk_size, qblk, eps, half):
    x = x_ref[0]                                             # (TILE_T, D) f32
    tile_t = x.shape[0]
    xn = _scale_norm_bf16(x, scala_ref[...], eps)

    u = _silu(jnp.dot(xn, wu_ref[...], preferred_element_type=jnp.float32) + bu_ref[...])
    v = _silu(jnp.dot(xn, wv_ref[...], preferred_element_type=jnp.float32) + bv_ref[...])
    base = _silu(jnp.dot(xn, wb_ref[...], preferred_element_type=jnp.float32) + bb_ref[...])

    sin = sin_ref[...]
    cos = cos_ref[...]
    aff = aff_ref[...]
    quad_q = _rope(base * aff[0:1, :] + aff[1:2, :], sin, cos, half).astype(jnp.bfloat16)
    quad_k = _rope(base * aff[2:3, :] + aff[3:4, :], sin, cos, half).astype(jnp.bfloat16)
    lin_q = _rope(base * aff[4:5, :] + aff[5:6, :], sin, cos, half).astype(jnp.bfloat16)
    v_bf = v.astype(jnp.bfloat16)

    # ---- linear (global) branch: lin_kv accumulated by pass 1 -------------
    linear = jnp.dot(lin_q, kv_ref[0].astype(jnp.bfloat16),
                     preferred_element_type=jnp.float32)     # (TILE_T, E)

    # ---- quadratic branch: lane/MXU-aligned block-diagonal matmuls --------
    s_dim = base.shape[-1]
    e_dim = v.shape[-1]
    nb = tile_t // qblk
    qq = quad_q.reshape(nb, qblk, s_dim)
    qk = quad_k.reshape(nb, qblk, s_dim)
    vb = v_bf.reshape(nb, qblk, e_dim)
    scores = jnp.einsum('pns,pms->pnm', qq, qk,
                        preferred_element_type=jnp.float32)  # (nb, QBLK, QBLK)
    # biasq holds the Toeplitz chunk bias on the 16x16 (chunk) diagonal blocks and a
    # large negative value elsewhere, so relu()**2 zeroes cross-chunk terms exactly.
    kern = jnp.square(jnp.maximum(scores * (1.0 / chunk_size) + biasq_ref[...], 0.0))
    quad = jnp.einsum('pnm,pme->pne', kern.astype(jnp.bfloat16), vb,
                      preferred_element_type=jnp.float32).reshape(tile_t, e_dim)

    # ---- gate + output projection ------------------------------------------
    # NOTE: output last dim = d_model; lane-dense (>=128) d_model avoids masked stores.
    gated = (u * (linear + quad)).astype(jnp.bfloat16)
    out = jnp.dot(gated, wo_ref[...], preferred_element_type=jnp.float32) + bo_ref[...]
    o_ref[0] = out.astype(o_ref.dtype)


# ---------------------------------------------------------------------------
# Wrapper
# ---------------------------------------------------------------------------
def _pick_tile_tokens(num_chunks, chunk_size, target_tokens):
    best = 1
    for cpt in range(1, num_chunks + 1):
        if num_chunks % cpt == 0 and cpt * chunk_size <= max(target_tokens, chunk_size):
            best = cpt
    return best * chunk_size


def _pick_qblk(tile_t, chunk_size):
    best = chunk_size
    for k in range(1, tile_t // chunk_size + 1):
        q = k * chunk_size
        if tile_t % q == 0 and q <= 128:
            best = q
    return best


def flash_linear_attention(query, params, *, chunk_size, s, max_pos, eps=1e-5,
                           tile_tokens=256):
    """query: (B, T, D) float32. Returns (B, T, D)."""
    B, T0, D = query.shape
    E = params['wu'].shape[1]
    half = s // 2
    N = chunk_size

    len_pad = (-T0) % N
    Tp = T0 + len_pad
    G = Tp // N
    x = jnp.pad(query, ((0, 0), (0, len_pad), (0, 0)))

    tile_t = _pick_tile_tokens(G, N, tile_tokens)   # multiple of chunk_size, divides Tp
    n_tiles = Tp // tile_t
    qblk = _pick_qblk(tile_t, N)                    # <=128, multiple of N, divides tile_t

    # RoPE tables, full-width so the kernel needs no lane split/concat.
    pos = jnp.arange(Tp, dtype=jnp.float32)
    inv_freq = 10000.0 ** (-jnp.arange(half, dtype=jnp.float32) / half)
    sinusoid = pos[:, None] * inv_freq[None, :]
    sin_h, cos_h = jnp.sin(sinusoid), jnp.cos(sinusoid)
    cos_full = jnp.concatenate([cos_h, cos_h], axis=-1)          # (Tp, s)
    sin_signed = jnp.concatenate([-sin_h, sin_h], axis=-1)       # (Tp, s)

    # Chunk relative-position bias (rel_pos_bias(max_pos)[:, :N, :N]) tiled on the
    # QBLK x QBLK block diagonal; off-diagonal gets -1e9 (relu^2 -> 0).
    idx = (max_pos - 1) + jnp.arange(N)[None, :] - jnp.arange(N)[:, None]
    bias_chunk = params['w'][idx]                                # (N, N)
    r = jnp.arange(qblk)
    same_chunk = (r[:, None] // N) == (r[None, :] // N)
    biasq = jnp.where(same_chunk, bias_chunk[r[:, None] % N, r[None, :] % N],
                      jnp.float32(-1e9))                         # (qblk, qblk)

    # Pack the eight (1, s) affine params into one (8, s) tile (single DMA / vreg).
    aff = jnp.concatenate([
        params['qqw'], params['qqb'], params['qkw'], params['qkb'],
        params['lqw'], params['lqb'], params['lkw'], params['lkb']], axis=0)

    # bf16 weights for the MXU; biases and accumulation stay f32.
    wu = params['wu'].astype(jnp.bfloat16)
    wv = params['wv'].astype(jnp.bfloat16)
    wb = params['wb'].astype(jnp.bfloat16)
    wo = params['wo'].astype(jnp.bfloat16)

    def const(shape):
        return pl.BlockSpec(shape, lambda b, t: (0,) * len(shape))

    x_spec = pl.BlockSpec((1, tile_t, D), lambda b, t: (b, t, 0))

    def seq_spec():
        return pl.BlockSpec((tile_t, s), lambda b, t: (t, 0))

    comp_acc = pltpu.CompilerParams(dimension_semantics=("parallel", "arbitrary"),
                                    vmem_limit_bytes=32 * 1024 * 1024)
    comp_par = pltpu.CompilerParams(dimension_semantics=("parallel", "parallel"),
                                    vmem_limit_bytes=32 * 1024 * 1024)

    # ---- Pass 1: global lin_kv per batch (reduction over sequence tiles) ----
    lin_kv = pl.pallas_call(
        functools.partial(lin_kv_kernel, chunk_size=N, eps=eps, half=half),
        out_shape=jax.ShapeDtypeStruct((B, s, E), jnp.float32),
        grid=(B, n_tiles),
        in_specs=[
            x_spec, const((1, 1)),
            const((D, E)), const((1, E)),
            const((D, s)), const((1, s)),
            const((8, s)),
            seq_spec(), seq_spec(),
        ],
        out_specs=pl.BlockSpec((1, s, E), lambda b, t: (b, 0, 0)),
        compiler_params=comp_acc,
    )(x, params['scala'], wv, params['bv'], wb, params['bb'], aff,
      sin_signed, cos_full)

    # ---- Pass 2: full per-tile computation (fully parallel grid) ------------
    out = pl.pallas_call(
        functools.partial(flash_out_kernel, chunk_size=N, qblk=qblk, eps=eps, half=half),
        out_shape=jax.ShapeDtypeStruct((B, Tp, D), query.dtype),
        grid=(B, n_tiles),
        in_specs=[
            x_spec, const((1, 1)),
            const((D, E)), const((1, E)),
            const((D, E)), const((1, E)),
            const((D, s)), const((1, s)),
            const((8, s)),
            seq_spec(), seq_spec(),
            const((qblk, qblk)),
            pl.BlockSpec((1, s, E), lambda b, t: (b, 0, 0)),
            const((E, D)), const((1, D)),
        ],
        out_specs=pl.BlockSpec((1, tile_t, D), lambda b, t: (b, t, 0)),
        compiler_params=comp_par,
    )(x, params['scala'], wu, params['bu'], wv, params['bv'], wb, params['bb'],
      aff, sin_signed, cos_full, biasq, lin_kv, wo, params['bo'])

    return out[:, :T0, :]


# ---------------------------------------------------------------------------
# Parameters + pure-JAX reference (module semantics, non-causal path)
# ---------------------------------------------------------------------------
def init_params(key, d_model, e, s, max_pos):
    ks = jax.random.split(key, 16)

    def linear(k, fin, fout):
        kw, kb = jax.random.split(k)
        lim = 1.0 / np.sqrt(fin)
        w = jax.random.uniform(kw, (fin, fout), jnp.float32, -lim, lim)
        b = jax.random.uniform(kb, (1, fout), jnp.float32, -lim, lim)
        return w, b

    wu, bu = linear(ks[0], d_model, e)   # u_proj
    wv, bv = linear(ks[1], d_model, e)   # v_proj
    wb, bb = linear(ks[2], d_model, s)   # base_proj
    wo, bo = linear(ks[3], e, d_model)   # o
    return dict(
        wu=wu, bu=bu, wv=wv, bv=bv, wb=wb, bb=bb, wo=wo, bo=bo,
        qqw=0.02 * jax.random.normal(ks[4], (1, s), jnp.float32),
        qqb=jnp.zeros((1, s), jnp.float32),
        qkw=0.02 * jax.random.normal(ks[5], (1, s), jnp.float32),
        qkb=jnp.zeros((1, s), jnp.float32),
        lqw=0.02 * jax.random.normal(ks[6], (1, s), jnp.float32),
        lqb=jnp.zeros((1, s), jnp.float32),
        lkw=0.02 * jax.random.normal(ks[7], (1, s), jnp.float32),
        lkb=jnp.zeros((1, s), jnp.float32),
        w=0.02 * jax.random.normal(ks[8], (2 * max_pos - 1,), jnp.float32),
        scala=jnp.ones((1, 1), jnp.float32),   # ScaleNorm scale (init = 1)
    )


def reference(query, params, *, chunk_size, s, max_pos, eps=1e-5):
    """Pure-JAX f32 re-implementation of the PyTorch forward (non-causal path)."""
    B, T0, D = query.shape
    len_pad = (-T0) % chunk_size
    Tp = T0 + len_pad
    x0 = jnp.pad(query, ((0, 0), (0, len_pad), (0, 0)))
    half = s // 2
    N = chunk_size
    G = Tp // N

    ms = jnp.mean(x0 * x0, axis=-1, keepdims=True)
    xn = x0 * jax.lax.rsqrt(ms + eps) * params['scala'][0, 0]
    silu = lambda z: z * jax.nn.sigmoid(z)
    u = silu(xn @ params['wu'] + params['bu'])
    v = silu(xn @ params['wv'] + params['bv'])
    base = silu(xn @ params['wb'] + params['bb'])

    pos = jnp.arange(Tp, dtype=jnp.float32)
    inv_freq = 10000.0 ** (-jnp.arange(half, dtype=jnp.float32) / half)
    sinusoid = pos[:, None] * inv_freq[None, :]
    sin, cos = jnp.sin(sinusoid), jnp.cos(sinusoid)

    def rope(t):
        x1, x2 = t[..., :half], t[..., half:]
        return jnp.concatenate([x1 * cos - x2 * sin, x2 * cos + x1 * sin], axis=-1)

    qq = rope(base * params['qqw'] + params['qqb']).reshape(B, G, N, s)
    qk = rope(base * params['qkw'] + params['qkb']).reshape(B, G, N, s)
    lq = rope(base * params['lqw'] + params['lqb']).reshape(B, G, N, s)
    lk = rope(base * params['lkw'] + params['lkb']).reshape(B, G, N, s)
    vc = v.reshape(B, G, N, -1)
    uc = u.reshape(B, G, N, -1)

    idx = (max_pos - 1) + jnp.arange(N)[None, :] - jnp.arange(N)[:, None]
    bias = params['w'][idx]

    scores = jnp.einsum('bgnk,bgmk->bgnm', qq, qk)
    kern = jnp.square(jnp.maximum(scores / N + bias, 0.0))
    quad = jnp.einsum('bgnm,bgme->bgne', kern, vc)

    lin_kv = jnp.einsum('bgnk,bgne->bgke', lk, vc) / N
    lin_kv = jnp.sum(lin_kv, axis=1)              # all-ones chunk mask (non-causal)
    linear = jnp.einsum('bgnk,bke->bgne', lq, lin_kv)

    xg = (uc * (linear + quad)).reshape(B, Tp, -1)
    out = xg @ params['wo'] + params['bo']
    return out[:, :T0, :]


if __name__ == "__main__":
    # Small, module-consistent shapes.
    d_model = 64
    expansion_factor = 2
    e = d_model * expansion_factor      # 128
    s = 128
    chunk_size = 16
    max_position_embeddings = 64
    B, T = 2, 248                       # pads to 256 -> 16 chunks

    key = jax.random.PRNGKey(0)
    kx, kp = jax.random.split(key)
    query = jax.random.normal(kx, (B, T, d_model), dtype=jnp.float32)
    params = init_params(kp, d_model, e, s, max_position_embeddings)

    out = flash_linear_attention(
        query, params, chunk_size=chunk_size, s=s, max_pos=max_position_embeddings,
        tile_tokens=128)                # 2 sequence tiles of 128 tokens, QBLK=128
    out = jax.block_until_ready(out)

    ref = reference(
        query, params, chunk_size=chunk_size, s=s, max_pos=max_position_embeddings)
    np.testing.assert_allclose(np.asarray(out), np.asarray(ref), rtol=2e-2, atol=2e-3)

    print("KERNEL_OK")
</pallas_src>

<mosaic_0001>
module attributes {stable_mosaic.version = 11 : i64} {
  func.func @lin_kv_kernel(%arg0: i32, %arg1: i32, %arg2: memref<1x128x64xf32, #tpu.memory_space<vmem>>, %arg3: memref<1x1xf32, #tpu.memory_space<vmem>>, %arg4: memref<64x128xbf16, #tpu.memory_space<vmem>>, %arg5: memref<1x128xf32, #tpu.memory_space<vmem>>, %arg6: memref<64x128xbf16, #tpu.memory_space<vmem>>, %arg7: memref<1x128xf32, #tpu.memory_space<vmem>>, %arg8: memref<8x128xf32, #tpu.memory_space<vmem>>, %arg9: memref<128x128xf32, #tpu.memory_space<vmem>>, %arg10: memref<128x128xf32, #tpu.memory_space<vmem>>, %arg11: memref<1x128x128xf32, #tpu.memory_space<vmem>>) attributes {dimension_semantics = [#tpu.dimension_semantics<parallel>, #tpu.dimension_semantics<arbitrary>], iteration_bounds = array<i64: 2, 2>, scalar_prefetch = 0 : i64, scratch_operands = 0 : i64, tpu.core_type = #tpu.core_type<tc>, window_params = [{transform_indices = @transform_0, window_bounds = array<i64: 1, 128, 64>}, {pipeline_mode = #tpu.pipeline_mode<synchronous>, transform_indices = @transform_1, window_bounds = array<i64: 1, 1>}, {pipeline_mode = #tpu.pipeline_mode<synchronous>, transform_indices = @transform_2, window_bounds = array<i64: 64, 128>}, {pipeline_mode = #tpu.pipeline_mode<synchronous>, transform_indices = @transform_3, window_bounds = array<i64: 1, 128>}, {pipeline_mode = #tpu.pipeline_mode<synchronous>, transform_indices = @transform_4, window_bounds = array<i64: 64, 128>}, {pipeline_mode = #tpu.pipeline_mode<synchronous>, transform_indices = @transform_5, window_bounds = array<i64: 1, 128>}, {pipeline_mode = #tpu.pipeline_mode<synchronous>, transform_indices = @transform_6, window_bounds = array<i64: 8, 128>}, {transform_indices = @transform_7, window_bounds = array<i64: 128, 128>}, {transform_indices = @transform_8, window_bounds = array<i64: 128, 128>}, {transform_indices = @transform_9, window_bounds = array<i64: 1, 128, 128>}]} {
    %c0_i32 = arith.constant 0 : i32
    %0 = arith.cmpi eq, %arg1, %c0_i32 : i32
    %1 = arith.extui %0 : i1 to i32
    %c0_i32_0 = arith.constant 0 : i32
    %2 = arith.cmpi ne, %1, %c0_i32_0 : i32
    scf.if %2 {
      %cst_33 = arith.constant 0.000000e+00 : f32
      %65 = vector.broadcast %cst_33 : f32 to vector<1x128x128xf32>
      %c0_34 = arith.constant 0 : index
      %c0_35 = arith.constant 0 : index
      %c0_36 = arith.constant 0 : index
      %66 = vector.load %arg11[%c0_34, %c0_35, %c0_36] : memref<1x128x128xf32, #tpu.memory_space<vmem>>, vector<1x128x128xf32>
      tpu.vector_store %arg11[%c0_34, %c0_35, %c0_36], %65 {strides = array<i32>} : memref<1x128x128xf32, #tpu.memory_space<vmem>>, vector<1x128x128xf32>,
    } else {
    }
    %c0 = arith.constant 0 : index
    %c0_1 = arith.constant 0 : index
    %c0_2 = arith.constant 0 : index
    %3 = vector.load %arg2[%c0, %c0_1, %c0_2] : memref<1x128x64xf32, #tpu.memory_space<vmem>>, vector<1x128x64xf32>
    %4 = vector.shape_cast %3 : vector<1x128x64xf32> to vector<128x64xf32>
    %c0_3 = arith.constant 0 : index
    %c0_4 = arith.constant 0 : index
    %5 = vector.load %arg3[%c0_3, %c0_4] : memref<1x1xf32, #tpu.memory_space<vmem>>, vector<1x1xf32>
    %6 = arith.mulf %4, %4 : vector<128x64xf32>
    %cst = arith.constant dense<0.000000e+00> : vector<128xf32>
    %7 = vector.multi_reduction <add>, %6, %cst [1] : vector<128x64xf32> to vector<128xf32>
    %8 = vector.shape_cast %7 : vector<128xf32> to vector<128x1xf32>
    %cst_5 = arith.constant 6.400000e+01 : f32
    %9 = vector.broadcast %cst_5 : f32 to vector<128x1xf32>
    %10 = arith.divf %8, %9 : vector<128x1xf32>
    %cst_6 = arith.constant 9.99999974E-6 : f32
    %11 = vector.broadcast %cst_6 : f32 to vector<128x1xf32>
    %12 = arith.addf %10, %11 : vector<128x1xf32>
    %13 = math.rsqrt %12 : vector<128x1xf32>
    %14 = vector.broadcast %13 : vector<128x1xf32> to vector<128x64xf32>
    %15 = arith.mulf %4, %14 : vector<128x64xf32>
    %16 = vector.broadcast %5 : vector<1x1xf32> to vector<128x64xf32>
    %17 = arith.mulf %15, %16 : vector<128x64xf32>
    %18 = arith.truncf %17 : vector<128x64xf32> to vector<128x64xbf16>
    %c0_7 = arith.constant 0 : index
    %c0_8 = arith.constant 0 : index
    %19 = vector.load %arg4[%c0_7, %c0_8] : memref<64x128xbf16, #tpu.memory_space<vmem>>, vector<64x128xbf16>
    %cst_9 = arith.constant dense<0.000000e+00> : vector<128x128xf32>
    %20 = tpu.matmul %18, %19, %cst_9 {dimension_numbers = #tpu.dot_dimension_numbers<[1], [0], [0], [1], [0, 0, 1, 1], [], []>} : vector<128x64xbf16>, vector<64x128xbf16>, vector<128x128xf32> -> vector<128x128xf32>
    %c0_10 = arith.constant 0 : index
    %c0_11 = arith.constant 0 : index
    %21 = vector.load %arg5[%c0_10, %c0_11] : memref<1x128xf32, #tpu.memory_space<vmem>>, vector<1x128xf32>
    %22 = vector.broadcast %21 : vector<1x128xf32> to vector<128x128xf32>
    %23 = arith.addf %20, %22 : vector<128x128xf32>
    %24 = arith.negf %23 : vector<128x128xf32>
    %25 = math.exp %24 : vector<128x128xf32>
    %cst_12 = arith.constant 1.000000e+00 : f32
    %26 = vector.broadcast %cst_12 : f32 to vector<128x128xf32>
    %27 = arith.addf %26, %25 : vector<128x128xf32>
    %28 = arith.divf %26, %27 : vector<128x128xf32>
    %29 = arith.mulf %23, %28 : vector<128x128xf32>
    %c0_13 = arith.constant 0 : index
    %c0_14 = arith.constant 0 : index
    %30 = vector.load %arg6[%c0_13, %c0_14] : memref<64x128xbf16, #tpu.memory_space<vmem>>, vector<64x128xbf16>
    %cst_15 = arith.constant dense<0.000000e+00> : vector<128x128xf32>
    %31 = tpu.matmul %18, %30, %cst_15 {dimension_numbers = #tpu.dot_dimension_numbers<[1], [0], [0], [1], [0, 0, 1, 1], [], []>} : vector<128x64xbf16>, vector<64x128xbf16>, vector<128x128xf32> -> vector<128x128xf32>
    %c0_16 = arith.constant 0 : index
    %c0_17 = arith.constant 0 : index
    %32 = vector.load %arg7[%c0_16, %c0_17] : memref<1x128xf32, #tpu.memory_space<vmem>>, vector<1x128xf32>
    %33 = vector.broadcast %32 : vector<1x128xf32> to vector<128x128xf32>
    %34 = arith.addf %31, %33 : vector<128x128xf32>
    %35 = arith.negf %34 : vector<128x128xf32>
    %36 = math.exp %35 : vector<128x128xf32>
    %cst_18 = arith.constant 1.000000e+00 : f32
    %37 = vector.broadcast %cst_18 : f32 to vector<128x128xf32>
    %38 = arith.addf %37, %36 : vector<128x128xf32>
    %39 = arith.divf %37, %38 : vector<128x128xf32>
    %40 = arith.mulf %34, %39 : vector<128x128xf32>
    %c0_19 = arith.constant 0 : index
    %c0_20 = arith.constant 0 : index
    %41 = vector.load %arg8[%c0_19, %c0_20] : memref<8x128xf32, #tpu.memory_space<vmem>>, vector<8x128xf32>
    %42 = vector.extract_strided_slice %41 {offsets = [6, 0], sizes = [1, 128], strides = [1, 1]} : vector<8x128xf32> to vector<1x128xf32>
    %43 = vector.broadcast %42 : vector<1x128xf32> to vector<128x128xf32>
    %44 = arith.mulf %40, %43 : vector<128x128xf32>
    %45 = vector.extract_strided_slice %41 {offsets = [7, 0], sizes = [1, 128], strides = [1, 1]} : vector<8x128xf32> to vector<1x128xf32>
    %46 = vector.broadcast %45 : vector<1x128xf32> to vector<128x128xf32>
    %47 = arith.addf %44, %46 : vector<128x128xf32>
    %c0_21 = arith.constant 0 : index
    %c0_22 = arith.constant 0 : index
    %48 = vector.load %arg9[%c0_21, %c0_22] : memref<128x128xf32, #tpu.memory_space<vmem>>, vector<128x128xf32>
    %c0_23 = arith.constant 0 : index
    %c0_24 = arith.constant 0 : index
    %49 = vector.load %arg10[%c0_23, %c0_24] : memref<128x128xf32, #tpu.memory_space<vmem>>, vector<128x128xf32>
    %50 = arith.mulf %47, %49 : vector<128x128xf32>
    %c64_i32 = arith.constant 64 : i32
    %51 = tpu.dynamic_rotate %47 by %c64_i32 dim 1 : vector<128x128xf32>, i32 -> vector<128x128xf32>
    %52 = arith.mulf %51, %48 : vector<128x128xf32>
    %53 = arith.addf %50, %52 : vector<128x128xf32>
    %54 = arith.truncf %53 : vector<128x128xf32> to vector<128x128xbf16>
    %55 = arith.truncf %29 : vector<128x128xf32> to vector<128x128xbf16>
    "tpu.trace_start"() <{level = 10 : i32, message = "tk,te->ke"}> : () -> ()
    %cst_25 = arith.constant dense<0.000000e+00> : vector<128x128xf32>
    %56 = tpu.matmul %54, %55, %cst_25 {dimension_numbers = #tpu.dot_dimension_numbers<[0], [0], [1], [1], [0, 1, 1, 1], [], []>} : vector<128x128xbf16>, vector<128x128xbf16>, vector<128x128xf32> -> vector<128x128xf32>
    "tpu.trace_stop"() : () -> ()
    %c0_26 = arith.constant 0 : index
    %c0_27 = arith.constant 0 : index
    %c0_28 = arith.constant 0 : index
    %57 = vector.load %arg11[%c0_26, %c0_27, %c0_28] : memref<1x128x128xf32, #tpu.memory_space<vmem>>, vector<1x128x128xf32>
    %58 = vector.shape_cast %57 : vector<1x128x128xf32> to vector<128x128xf32>
    %cst_29 = arith.constant 6.250000e-02 : f32
    %59 = vector.broadcast %cst_29 : f32 to vector<128x128xf32>
    %60 = arith.mulf %56, %59 : vector<128x128xf32>
    %61 = arith.addf %58, %60 : vector<128x128xf32>
    %c0_30 = arith.constant 0 : index
    %c0_31 = arith.constant 0 : index
    %c0_32 = arith.constant 0 : index
    %62 = vector.load %arg11[%c0_30, %c0_31, %c0_32] : memref<1x128x128xf32, #tpu.memory_space<vmem>>, vector<1x128x128xf32>
    %63 = vector.shape_cast %62 : vector<1x128x128xf32> to vector<128x128xf32>
    %64 = vector.shape_cast %61 : vector<128x128xf32> to vector<1x128x128xf32>
    tpu.vector_store %arg11[%c0_30, %c0_31, %c0_32], %64 {strides = array<i32>} : memref<1x128x128xf32, #tpu.memory_space<vmem>>, vector<1x128x128xf32>,
    return
  }
  func.func @transform_0(%arg0: i32, %arg1: i32) -> (i32, i32, i32) {
    %c0_i32 = arith.constant 0 : i32
    %c0_i32_0 = arith.constant 0 : i32
    return %arg0, %arg1, %c0_i32 : i32, i32, i32
  }
  func.func @transform_1(%arg0: i32, %arg1: i32) -> (i32, i32) {
    %c0_i32 = arith.constant 0 : i32
    %c0_i32_0 = arith.constant 0 : i32
    %c0_i32_1 = arith.constant 0 : i32
    return %c0_i32, %c0_i32_0 : i32, i32
  }
  func.func @transform_2(%arg0: i32, %arg1: i32) -> (i32, i32) {
    %c0_i32 = arith.constant 0 : i32
    %c0_i32_0 = arith.constant 0 : i32
    %c0_i32_1 = arith.constant 0 : i32
    return %c0_i32, %c0_i32_0 : i32, i32
  }
  func.func @transform_3(%arg0: i32, %arg1: i32) -> (i32, i32) {
    %c0_i32 = arith.constant 0 : i32
    %c0_i32_0 = arith.constant 0 : i32
    %c0_i32_1 = arith.constant 0 : i32
    return %c0_i32, %c0_i32_0 : i32, i32
  }
  func.func @transform_4(%arg0: i32, %arg1: i32) -> (i32, i32) {
    %c0_i32 = arith.constant 0 : i32
    %c0_i32_0 = arith.constant 0 : i32
    %c0_i32_1 = arith.constant 0 : i32
    return %c0_i32, %c0_i32_0 : i32, i32
  }
  func.func @transform_5(%arg0: i32, %arg1: i32) -> (i32, i32) {
    %c0_i32 = arith.constant 0 : i32
    %c0_i32_0 = arith.constant 0 : i32
    %c0_i32_1 = arith.constant 0 : i32
    return %c0_i32, %c0_i32_0 : i32, i32
  }
  func.func @transform_6(%arg0: i32, %arg1: i32) -> (i32, i32) {
    %c0_i32 = arith.constant 0 : i32
    %c0_i32_0 = arith.constant 0 : i32
    %c0_i32_1 = arith.constant 0 : i32
    return %c0_i32, %c0_i32_0 : i32, i32
  }
  func.func @transform_7(%arg0: i32, %arg1: i32) -> (i32, i32) {
    %c0_i32 = arith.constant 0 : i32
    %c0_i32_0 = arith.constant 0 : i32
    return %arg1, %c0_i32 : i32, i32
  }
  func.func @transform_8(%arg0: i32, %arg1: i32) -> (i32, i32) {
    %c0_i32 = arith.constant 0 : i32
    %c0_i32_0 = arith.constant 0 : i32
    return %arg1, %c0_i32 : i32, i32
  }
  func.func @transform_9(%arg0: i32, %arg1: i32) -> (i32, i32, i32) {
    %c0_i32 = arith.constant 0 : i32
    %c0_i32_0 = arith.constant 0 : i32
    %c0_i32_1 = arith.constant 0 : i32
    return %arg0, %c0_i32, %c0_i32_0 : i32, i32, i32
  }
}

</mosaic_0001>

<bundles_post_ra>
// kernel: tpu_custom_call.1
= control target key start
LH: loop header
LB: loop body
LE: loop exit
PB: predicated region body
PF: predicated region fallthrough
CT: control target
= control target key end

     0   :  { %s2905_s0 = inlined_call_operand.vmem [shape: f32[2,256,64], index: 0, kind: input, shape index: {}]   ;;  %s2906_s1 = inlined_call_operand.<no memory space> [shape: f32[1,1], index: 1, kind: input, shape index: {}]   ;;  %s2907_s2 = inlined_call_operand.vmem [shape: bf16[64,128], index: 2, kind: input, shape index: {}]   ;;  %s2908_s3 = inlined_call_operand.vmem [shape: f32[1,128], index: 3, kind: input, shape index: {}]   ;;  %s2909_s4 = inlined_call_operand.vmem [shape: bf16[64,128], index: 4, kind: input, shape index: {}]   ;;  %s2910_s5 = inlined_call_operand.vmem [shape: f32[1,128], index: 5, kind: input, shape index: {}]   ;;  %s2911_s6 = inlined_call_operand.vmem [shape: f32[8,128], index: 6, kind: input, shape index: {}]   ;;  %s2912_s7 = inlined_call_operand.vmem [shape: f32[256,128], index: 7, kind: input, shape index: {}]   ;;  %s2913_s8 = inlined_call_operand.vmem [shape: f32[256,128], index: 8, kind: input, shape index: {}]   ;;  %s2914_s9 = inlined_call_operand.hbm [shape: f32[2,128,128], index: 9, kind: output, shape index: {}]  }
   0x1   :  { %v14_v0 = vstv %s2906_s1 }
   0x2   :  { %15 = vst [vmem:[#allocation2] sm:$0x1] %v14_v0 }
   0x3   :  { %16 = vsyncpa [#allocation4], 0 }
   0x4   :  { %18 = vsyncpa [#allocation4 + $0x1], 0  ;;  %s2202_s11 = smov 0   ;;  %s2204_s12 = smov 0  }
   0x5   :  { %s2206_s13 = smov 0   ;;  %s2208_s14 = smov 0  }
   0x6   :  { %s2210_s15 = smov 0   ;;  %s2212_s16 = smov 0  }
   0x7   :  { %s2214_s17 = smov 0   ;;  %s2216_s18 = smov 0  }
   0x8 LB: > { %2922 = sst [smem:[#allocation6_spill]] %s2113_s11  ;;  %s1589_s1 = sadd.s32 4294967295, %s2141_s18   ;;  %s2141_s18 = sphi %s2216_s18, %s24_s18   ;;  %s2137_s17 = sphi %s2214_s17, %s2940_s17   ;;  %s2133_s16 = sphi %s2212_s16, %s2939_s16   ;;  %s2129_s15 = sphi %s2210_s15, %s2938_s15   ;;  %s2125_s14 = sphi %s2208_s14, %s2937_s14   ;;  %s2121_s13 = sphi %s2206_s13, %s2936_s13   ;;  %s2117_s12 = sphi %s2204_s12, %s2942_s12   ;;  %s2113_s11 = sphi %s2202_s11, %s2941_s11  }
   0x9   : > { %2923 = sst [smem:[#allocation7_spill]] %s2121_s13  ;;  %s1590_s19 = sadd.s32 4294967294, %s2141_s18  }
   0xa   : > { %2924 = sst [smem:[#allocation8_spill]] %s2133_s16  ;;  %s33_s20 = sadd.s32 1, %s2133_s16 }
   0xb   : > { %2925 = sst [smem:[#allocation9_spill]] %s2137_s17  ;;  %p34_p0 = scmp.ge.s32.totalorder %s33_s20, 2 }
   0xc   : > { %s36_s21 = sadd.s32 1, %s2137_s17  ;;  %p259_p1 = scmp.ne.s32.totalorder %s2121_s13, %s2117_s12 }
   0xd   : > { %p260_p2 = scmp.eq.s32.totalorder %s1589_s1, 3  ;;  %s2944_s20 = smov (%p34_p0, %s33_s20), 0 }
   0xe   : > { %2926 = sst [smem:[#allocation10_spill]] %s2944_s20  ;;  %s2946_s21 = smov (!%p34_p0, %s36_s21), %s2137_s17 }
   0xf   : > { %p2251_p3 = por %p260_p2, %p259_p1  ;;  %p265_p4 = scmp.ne.s32.totalorder %s2117_s12, %s2113_s11 }
  0x10   : > { %p38_p5 = scmp.ge.s32.totalorder %s2946_s21, 2  ;;  %p266_p6 = scmp.eq.s32.totalorder %s1590_s19, 3 }
  0x11   : > { %p1593_p7 = scmp.ge.s32.totalorder %s2141_s18, 1  ;;  %p333_p8 = scmp.lt.s32.totalorder %s2141_s18, 5 }
  0x12   : > { %s2948_s21 = smov (%p38_p5, %s2946_s21), 0  ;;  %p2261_p9 = por %p266_p6, %p265_p4 }
  0x13   : > { %2928 = sst [smem:[#allocation11_spill]] %s2948_s21  ;;  %p334_p10 = pnand %p1593_p7, %p333_p8 }
  0x14   : > { %s2929_s23 = scalar_select %p2261_p9, 1, 0 }
  0x15   : > { %s246_s24 = ssub.s32 %s2137_s17, %s2948_s21  ;;  %s249_s25 = sadd.s32 1, %s2121_s13 }
  0x16   : > { %2930 = sst [smem:[#allocation12_spill]] %s2929_s23  ;;  %p247_p11 = scmp.eq.s32.totalorder %s246_s24, 0 }
  0x17   : > { %337 = sbr.rel (%p334_p10) target bundleno = 952 (0x3b8), region = 56  ;;  %s2919_s27 = sand.u32 (!%p334_p10), 1, %s2117_s12  }
  0x18   : > { %s2269_s26 = scalar_select %p247_p11, %s2121_s13, %s249_s25  }
  0x19   : > { %s1595_s28 = sshll.u32 (!%p334_p10), %s2125_s14, 4  ;;  %s1594_s29 = sshll.u32 (!%p334_p10), %s2919_s27, 7 }
  0x1a   : > { %2931 = sst [smem:[#allocation13_spill]] %s2269_s26  ;;  %p384_p12 = scmp.lt.s32.totalorder (!%p334_p10), %s2129_s15, 1 }
  0x1b   : > { %p386_p13 = scmp.lt.s32.totalorder (!%p334_p10), %s1595_s28, 31  ;;  %s2292_s11 = scalar_lea.vmem (!%p334_p10), [#allocation3], %s1594_s29 }
  0x1c   : > { %s385_s30 = scalar_select %p384_p12, %s2129_s15, 1 }
  0x1d   : > { %s2950_s28 = smov (!%p386_p13, %s1595_s28), 31  ;;  %p1602_p0 = scmp.ne.s32.totalorder %s2125_s14, 0 }
  0x1e   : > { %s1596_s10 = sshll.u32 %s385_s30, 5  ;;  %s1599_s19 = sshll.u32 %s2950_s28, 3 }
  0x1f   : > { %s389_s1 = sadd.s32 %s1596_s10, %s2950_s28  ;;  %s2280_s20 = scalar_lea.vmem %s2912_s7, %s1599_s19 }
  0x20   : > { %s1597_s24 = sshll.u32 %s389_s1, 3  ;;  %s2290_s23 = scalar_lea.vmem %s2913_s8, %s1599_s19 }
  0x21   : > { %s2285_s26 = scalar_lea.vmem %s2905_s0, %s1597_s24  ;;  %409 = sbr.rel (%p1602_p0) target bundleno = 47 (0x2f), region = 60 }
  0x26   : > { %v2143_v1 = vmov 0.0  }
  0x27   : > { %410 = vst [vmem:[%s2292_s11] sm:$0xff] %v2143_v1  ;;  %411 = vst [vmem:[%s2292_s11 + $0x8] sm:$0xff] %v2143_v1 }
  0x28   : > { %412 = vst [vmem:[%s2292_s11 + $0x10] sm:$0xff] %v2143_v1  ;;  %413 = vst [vmem:[%s2292_s11 + $0x18] sm:$0xff] %v2143_v1 }
  0x29   : > { %414 = vst [vmem:[%s2292_s11 + $0x20] sm:$0xff] %v2143_v1  ;;  %415 = vst [vmem:[%s2292_s11 + $0x28] sm:$0xff] %v2143_v1 }
  0x2a   : > { %416 = vst [vmem:[%s2292_s11 + $0x30] sm:$0xff] %v2143_v1  ;;  %417 = vst [vmem:[%s2292_s11 + $0x38] sm:$0xff] %v2143_v1 }
  0x2b   : > { %418 = vst [vmem:[%s2292_s11 + $0x40] sm:$0xff] %v2143_v1  ;;  %419 = vst [vmem:[%s2292_s11 + $0x48] sm:$0xff] %v2143_v1 }
  0x2c   : > { %420 = vst [vmem:[%s2292_s11 + $0x50] sm:$0xff] %v2143_v1  ;;  %421 = vst [vmem:[%s2292_s11 + $0x58] sm:$0xff] %v2143_v1 }
  0x2d   : > { %422 = vst [vmem:[%s2292_s11 + $0x60] sm:$0xff] %v2143_v1  ;;  %423 = vst [vmem:[%s2292_s11 + $0x68] sm:$0xff] %v2143_v1 }
  0x2e   : > { %424 = vst [vmem:[%s2292_s11 + $0x70] sm:$0xff] %v2143_v1  ;;  %425 = vst [vmem:[%s2292_s11 + $0x78] sm:$0xff] %v2143_v1 }
  0x2f PF: > { %v2312_v2 = vld [vmem:[%s2285_s26 + $0x10] sm:$0xff]  ;;  %vm459_vm0 = vcmask 523264   ;;  %v2315_v3 = vld [vmem:[%s2285_s26] sm:$0xff]  ;;  %v2318_v4 = vld [vmem:[%s2285_s26 + $0x18] sm:$0xff]  ;;  %v2144_v9 = vmov 0   ;;  %s2145_s28 = smov 64  }
  0x30   : > { %v445_v5 = vmul.f32 %v2312_v2, %v2312_v2  ;;  %v443_v6 = vmul.f32 %v2315_v3, %v2315_v3  ;;  %v446_v7 = vmul.f32 %v2318_v4, %v2318_v4  ;;  %v2327_v8 = vld [vmem:[%s2285_s26 + $0x8] sm:$0xff]  ;;  %1880 = vset.pattern.permute.xlu0 %v2144_v9  ;;  %v2335_v12 = vld [vmem:[%s2285_s26 + $0x20] sm:$0xff]  ;;  %v2346_v19 = vld [vmem:[%s2285_s26 + $0x38] sm:$0xff]  ;;  %s2146_s24 = smov [#allocation3]  }
  0x31   : > { %v444_v10 = vmul.f32 %v2327_v8, %v2327_v8  ;;  %v2332_v11 = vld [vmem:[%s2285_s26 + $0x28] sm:$0xff]  ;;  %v447_v18 = vmul.f32 %v2335_v12, %v2335_v12  ;;  %v2349_v20 = vld [vmem:[%s2285_s26 + $0x30] sm:$0xff]  ;;  %v450_v24 = vmul.f32 %v2346_v19, %v2346_v19  ;;  %v2361_v26 = vld [vmem:[%s2285_s26 + $0x40] sm:$0xff]  ;;  %s2053_s25 = sshll.u32 %s2146_s24, 4  ;;  %s2054_s25 = int_to_ptr.vmem [resolvable:$false] %s2053_s25 }
  0x32   : > { %v466_v13 = vsel %vm459_vm0, %v445_v5, 0.0  ;;  %v460_v14 = vsel %vm459_vm0, %v443_v6, 0.0  ;;  %v469_v15 = vsel %vm459_vm0, %v446_v7, 0.0  ;;  %v448_v17 = vmul.f32 %v2332_v11, %v2332_v11  ;;  %v2352_v21 = vld [vmem:[%s2285_s26 + $0x48] sm:$0xff]  ;;  %v2370_v31 = vld [vmem:[%s2285_s26 + $0x58] sm:$0xff]  ;;  %v2373_v32 = vld [vmem:[%s2285_s26 + $0x50] sm:$0xff] }
  0x33   : > { %467 = vadd.xlane.f32.xlu1 %v466_v13  ;;  %461 = vadd.xlane.f32.xlu0 %v460_v14  ;;  %v463_v16 = vsel %vm459_vm0, %v444_v10, 0.0  ;;  %v472_v23 = vsel %vm459_vm0, %v447_v18, 0.0  ;;  %v449_v25 = vmul.f32 %v2349_v20, %v2349_v20  ;;  %v481_v27 = vsel %vm459_vm0, %v450_v24, 0.0  ;;  %v2382_v37 = vld [vmem:[%s2285_s26 + $0x68] sm:$0xff]  ;;  %v2385_v38 = vld [vmem:[%s2285_s26 + $0x60] sm:$0xff]  ;;  %v2394_v43 = vld [vmem:[%s2285_s26 + $0x78] sm:$0xff] }
  0x34   : > { %v475_v22 = vsel %vm459_vm0, %v448_v17, 0.0  ;;  %v452_v29 = vmul.f32 %v2352_v21, %v2352_v21  ;;  %v451_v30 = vmul.f32 %v2361_v26, %v2361_v26  ;;  %v454_v35 = vmul.f32 %v2370_v31, %v2370_v31  ;;  %v2397_v44 = vld [vmem:[%s2285_s26 + $0x70] sm:$0xff]  ;;  %v1881_v51 = vld [vmem:[%s2907_s2 + $0x18] sm:$0xff]   ;;  %v1885_v55 = vld [vmem:[%s2907_s2 + $0x8] sm:$0xff]   ;;  %s2055_s13 = scalar_lea.vmem %s2054_s25, 4096 }
  0x35   : > { %v478_v28 = vsel %vm459_vm0, %v449_v25, 0.0  ;;  %v453_v36 = vmul.f32 %v2373_v32, %v2373_v32  ;;  %v456_v41 = vmul.f32 %v2382_v37, %v2382_v37  ;;  %v455_v42 = vmul.f32 %v2385_v38, %v2385_v38  ;;  %v1882_v52 = vld [vmem:[%s2909_s4 + $0x18] sm:$0xff]   ;;  %1708 = vmatprep.subr.bf16.mxu0 %v1881_v51  ;;  %v1883_v53 = vld [vmem:[%s2907_s2 + $0x10] sm:$0xff]   ;;  %v1886_v56 = vld [vmem:[%s2909_s4 + $0x8] sm:$0xff]  }
  0x36   : > { %v487_v33 = vsel %vm459_vm0, %v452_v29, 0.0  ;;  %v484_v34 = vsel %vm459_vm0, %v451_v30, 0.0  ;;  %v493_v39 = vsel %vm459_vm0, %v454_v35, 0.0  ;;  %v458_v47 = vmul.f32 %v2394_v43, %v2394_v43  ;;  %1732 = vmatprep.subr.bf16.mxu1 %v1882_v52  ;;  %1709 = vmatpush3.bf16.msra.mxu0 %v1881_v51  ;;  %v1884_v54 = vld [vmem:[%s2909_s4 + $0x10] sm:$0xff]   ;;  %v1887_v57 = vld [vmem:[%s2907_s2] sm:$0xff]  }
  0x37   : > { %470 = vadd.xlane.f32.xlu1 %v469_v15  ;;  %464 = vadd.xlane.f32.xlu0 %v463_v16  ;;  %v490_v40 = vsel %vm459_vm0, %v453_v36, 0.0  ;;  %v499_v45 = vsel %vm459_vm0, %v456_v41, 0.0  ;;  %v496_v46 = vsel %vm459_vm0, %v455_v42, 0.0  ;;  %v457_v48 = vmul.f32 %v2397_v44, %v2397_v44  ;;  %v1888_v58 = vld [vmem:[%s2909_s4] sm:$0xff]  }
  0x38   : > { %v505_v49 = vsel %vm459_vm0, %v458_v47, 0.0  ;;  %1733 = vmatpush3.bf16.msra.mxu1 %v1882_v52  ;;  %1710 = vmatprep.subr.bf16.mxu0 %v1883_v53  ;;  %v1603_v59 = vld [vmem:[#allocation2] ss:$0 sm:$0xff] }
  0x39   : > { %v502_v50 = vsel %vm459_vm0, %v457_v48, 0.0  ;;  %1734 = vmatprep.subr.bf16.mxu1 %v1884_v54 }
  0x3a   : > { %1711 = vmatpush3.bf16.msra.mxu0 %v1883_v53 }
  0x3b   : > { %476 = vadd.xlane.f32.xlu1 %v475_v22  ;;  %473 = vadd.xlane.f32.xlu0 %v472_v23 }
  0x3c   : > { %1735 = vmatpush3.bf16.msra.mxu1 %v1884_v54  ;;  %1712 = vmatprep.subr.bf16.mxu0 %v1885_v55 }
  0x3d   : > { %1736 = vmatprep.subr.bf16.mxu1 %v1886_v56 }
  0x3e   : > { %1713 = vmatpush3.bf16.msra.mxu0 %v1885_v55 }
  0x3f   : > { %482 = vadd.xlane.f32.xlu1 %v481_v27  ;;  %479 = vadd.xlane.f32.xlu0 %v478_v28 }
  0x40   : > { %1737 = vmatpush3.bf16.msra.mxu1 %v1886_v56  ;;  %1714 = vmatprep.subr.bf16.mxu0 %v1887_v57 }
  0x41   : > { %1738 = vmatprep.subr.bf16.mxu1 %v1888_v58 }
  0x42   : > { %1715 = vmatpush3.bf16.msra.mxu0 %v1887_v57 }
  0x43   : > { %488 = vadd.xlane.f32.xlu1 %v487_v33  ;;  %485 = vadd.xlane.f32.xlu0 %v484_v34 }
  0x44   : > { %1739 = vmatpush3.bf16.msra.mxu1 %v1888_v58 }
  0x47   : > { %494 = vadd.xlane.f32.xlu1 %v493_v39  ;;  %491 = vadd.xlane.f32.xlu0 %v490_v40 }
  0x4b   : > { %500 = vadd.xlane.f32.xlu1 %v499_v45  ;;  %497 = vadd.xlane.f32.xlu0 %v496_v46 }
  0x4f   : > { %506 = vadd.xlane.f32.xlu1 %v505_v49  ;;  %503 = vadd.xlane.f32.xlu0 %v502_v50 }
  0x65   : > { %579 = vperm.xlu0 %1880, %v1603_v59  }
  0xbc   : > { %v468_v60 = vpop.xlane.xlu1 %467  ;;  %v462_v61 = vpop.xlane.xlu0 %461 }
  0xbd   : > { %v511_v0 = vmul.f32 0.015625, %v468_v60  ;;  %v509_v1 = vmul.f32 0.015625, %v462_v61 }
  0xbf   : > { %v527_v10 = vadd.f32 1e-05, %v511_v0  ;;  %v525_v14 = vadd.f32 1e-05, %v509_v1 }
  0xc0   : > { %v471_v62 = vpop.xlane.xlu1 %470  ;;  %v465_v63 = vpop.xlane.xlu0 %464 }
  0xc1   : > { %v512_v7 = vmul.f32 0.015625, %v471_v62  ;;  %v510_v13 = vmul.f32 0.015625, %v465_v63  ;;  %1889 = vrsqrt.f32 %v527_v10 }
  0xc2   : > { %1891 = vrsqrt.f32 %v525_v14 }
  0xc3   : > { %v528_v18 = vadd.f32 1e-05, %v512_v7  ;;  %v526_v23 = vadd.f32 1e-05, %v510_v13 }
  0xc4   : > { %v477_v5 = vpop.xlane.xlu1 %476  ;;  %v474_v6 = vpop.xlane.xlu0 %473 }
  0xc5   : > { %v514_v9 = vmul.f32 0.015625, %v477_v5  ;;  %v513_v15 = vmul.f32 0.015625, %v474_v6  ;;  %1893 = vrsqrt.f32 %v528_v18 }
  0xc7   : > { %v530_v22 = vadd.f32 1e-05, %v514_v9  ;;  %v529_v25 = vadd.f32 1e-05, %v513_v15 }
  0xc8   : > { %v483_v16 = vpop.xlane.xlu1 %482  ;;  %v480_v17 = vpop.xlane.xlu0 %479 }
  0xc9   : > { %v516_v24 = vmul.f32 0.015625, %v483_v16  ;;  %1895 = vrsqrt.f32 %v530_v22  ;;  %v515_v33 = vmul.f32 0.015625, %v480_v17 }
  0xca   : > { %1897 = vrsqrt.f32 %v526_v23 }
  0xcb   : > { %v532_v34 = vadd.f32 1e-05, %v516_v24  ;;  %1899 = vrsqrt.f32 %v529_v25  ;;  %v531_v41 = vadd.f32 1e-05, %v515_v33 }
  0xcc   : > { %v489_v27 = vpop.xlane.xlu1 %488  ;;  %v486_v28 = vpop.xlane.xlu0 %485 }
  0xcd   : > { %v518_v29 = vmul.f32 0.015625, %v489_v27  ;;  %v517_v30 = vmul.f32 0.015625, %v486_v28  ;;  %1901 = vrsqrt.f32 %v532_v34 }
  0xce   : > { %v1890_v52 = vpop.eup %1889 }
  0xcf   : > { %v534_v35 = vadd.f32 1e-05, %v518_v29  ;;  %v533_v40 = vadd.f32 1e-05, %v517_v30  ;;  %v1892_v55 = vpop.eup %1891  ;;  %v559_v9 = vmul.f32 %v1890_v52, %v2312_v2 }
  0xd0   : > { %v495_v36 = vpop.xlane.xlu1 %494  ;;  %v492_v39 = vpop.xlane.xlu0 %491  ;;  %v557_v6 = vmul.f32 %v1892_v55, %v2315_v3 }
  0xd1   : > { %v520_v42 = vmul.f32 0.015625, %v495_v36  ;;  %v519_v45 = vmul.f32 0.015625, %v492_v39  ;;  %1903 = vrsqrt.f32 %v534_v35 }
  0xd2   : > { %1905 = vrsqrt.f32 %v533_v40  ;;  %v1894_v58 = vpop.eup %1893 }
  0xd3   : > { %1907 = vrsqrt.f32 %v531_v41  ;;  %v536_v50 = vadd.f32 1e-05, %v520_v42  ;;  %v535_v51 = vadd.f32 1e-05, %v519_v45  ;;  %v560_v0 = vmul.f32 %v1894_v58, %v2318_v4 }
  0xd4   : > { %v501_v46 = vpop.xlane.xlu1 %500  ;;  %v498_v47 = vpop.xlane.xlu0 %497 }
  0xd5   : > { %v522_v48 = vmul.f32 0.015625, %v501_v46  ;;  %v521_v49 = vmul.f32 0.015625, %v498_v47  ;;  %1909 = vrsqrt.f32 %v536_v50 }
  0xd6   : > { %v1896_v59 = vpop.eup %1895  ;;  %1911 = vrsqrt.f32 %v535_v51 }
  0xd7   : > { %v538_v53 = vadd.f32 1e-05, %v522_v48  ;;  %v537_v56 = vadd.f32 1e-05, %v521_v49  ;;  %v1898_v61 = vpop.eup %1897  ;;  %v562_v1 = vmul.f32 %v1896_v59, %v2332_v11 }
  0xd8   : > { %v507_v54 = vpop.xlane.xlu1 %506  ;;  %v504_v57 = vpop.xlane.xlu0 %503  ;;  %v558_v7 = vmul.f32 %v1898_v61, %v2327_v8 }
  0xd9   : > { %v524_v60 = vmul.f32 0.015625, %v507_v54  ;;  %1913 = vrsqrt.f32 %v538_v53  ;;  %v523_v62 = vmul.f32 0.015625, %v504_v57  ;;  %v1900_v63 = vpop.eup %1899 }
  0xda   : > { %1915 = vrsqrt.f32 %v537_v56  ;;  %v1902_v10 = vpop.eup %1901  ;;  %v561_v15 = vmul.f32 %v1900_v63, %v2335_v12 }
  0xdb   : > { %v540_v5 = vadd.f32 1e-05, %v524_v60  ;;  %v539_v13 = vadd.f32 1e-05, %v523_v62  ;;  %v564_v2 = vmul.f32 %v1902_v10, %v2346_v19 }
  0xdd   : > { %1917 = vrsqrt.f32 %v540_v5 }
  0xde   : > { %v1904_v16 = vpop.eup %1903  ;;  %1919 = vrsqrt.f32 %v539_v13 }
  0xdf   : > { %v1906_v4 = vpop.eup %1905  ;;  %v566_v28 = vmul.f32 %v1904_v16, %v2352_v21 }
  0xe0   : > { %v580_v14 = vpop.permute.xlu0 %579  ;;  %v1908_v25 = vpop.eup %1907  ;;  %v565_v12 = vmul.f32 %v1906_v4, %v2361_v26 }
  0xe1   : > { %v582_v17 = vmul.f32 %v580_v14, %v557_v6  ;;  %v583_v18 = vmul.f32 %v580_v14, %v558_v7  ;;  %v584_v22 = vmul.f32 %v580_v14, %v559_v9  ;;  %v585_v23 = vmul.f32 %v580_v14, %v560_v0 }
  0xe2   : > { %v586_v24 = vmul.f32 %v580_v14, %v561_v15  ;;  %v587_v11 = vmul.f32 %v580_v14, %v562_v1  ;;  %v563_v29 = vmul.f32 %v1908_v25, %v2349_v20  ;;  %v1910_v30 = vpop.eup %1909  ;;  %v589_v34 = vmul.f32 %v580_v14, %v564_v2 }
  0xe3   : > { %v598_v3 = vpack.c.bf16 %v583_v18, %v582_v17  ;;  %v599_v27 = vpack.c.bf16 %v585_v23, %v584_v22  ;;  %v1912_v19 = vpop.eup %1911  ;;  %v590_v36 = vmul.f32 %v580_v14, %v565_v12  ;;  %v591_v39 = vmul.f32 %v580_v14, %v566_v28 }
  0xe4   : > { %v600_v8 = vpack.c.bf16 %v587_v11, %v586_v24  ;;  %v588_v33 = vmul.f32 %v580_v14, %v563_v29  ;;  %v567_v21 = vmul.f32 %v1912_v19, %v2373_v32  ;;  %v568_v41 = vmul.f32 %v1910_v30, %v2370_v31 }
  0xe5   : > { %1716 = vmatprep.mubr.msk.bf16.mxu0 %vm459_vm0, %v598_v3  ;;  %1740 = vmatprep.mubr.msk.bf16.mxu1 %vm459_vm0, %v598_v3  ;;  %v602_v42 = vpack.c.bf16 %v591_v39, %v590_v36 }
  0xe6   : > { %1717 = vmatmul.mubr.msk.bf16.vlgmr.msra.gmra.mxu0 %vm459_vm0, %v599_v27  ;;  %1741 = vmatmul.mubr.msk.bf16.vlgmr.msra.gmra.mxu1 %vm459_vm0, %v599_v27  ;;  %v1914_v35 = vpop.eup %1913  ;;  %v601_v40 = vpack.c.bf16 %v589_v34, %v588_v33  ;;  %v592_v47 = vmul.f32 %v580_v14, %v567_v21  ;;  %v593_v48 = vmul.f32 %v580_v14, %v568_v41  ;;  %v2505_v27 = vld [vmem:[%s2908_s3] ss:$0 sm:$0xff] }
  0xe7   : > { %1720 = vmatprep.mubr.msk.bf16.mxu0 %vm459_vm0, %v600_v8  ;;  %1744 = vmatprep.mubr.msk.bf16.mxu1 %vm459_vm0, %v600_v8  ;;  %v1916_v26 = vpop.eup %1915  ;;  %v570_v45 = vmul.f32 %v1914_v35, %v2382_v37 }
  0xe8   : > { %v569_v20 = vmul.f32 %v1916_v26, %v2385_v38  ;;  %v603_v31 = vpack.c.bf16 %v593_v48, %v592_v47  ;;  %v1127_v26 = vlaneseq }
  0xe9   : > { %v595_v50 = vmul.f32 %v580_v14, %v570_v45 }
  0xea   : > { %v1918_v46 = vpop.eup %1917  ;;  %v594_v32 = vmul.f32 %v580_v14, %v569_v20 }
  0xeb   : > { %v1920_v49 = vpop.eup %1919  ;;  %v572_v38 = vmul.f32 %v1918_v46, %v2394_v43  ;;  %v2466_v43 = vld [vmem:[%s2910_s5] ss:$0 sm:$0xff] }
  0xec   : > { %v571_v51 = vmul.f32 %v1920_v49, %v2397_v44  ;;  %v604_v37 = vpack.c.bf16 %v595_v50, %v594_v32  ;;  %v1128_v32 = vshrl.u32 %v1127_v26, 7 }
  0xed   : > { %v597_v53 = vmul.f32 %v580_v14, %v572_v38 }
  0xee   : > { %1721 = vmatmul.mubr.msk.bf16.gmra.mxu0 %vm459_vm0, %v601_v40  ;;  %1745 = vmatmul.mubr.msk.bf16.gmra.mxu1 %vm459_vm0, %v601_v40  ;;  %v596_v52 = vmul.f32 %v580_v14, %v571_v51 }
  0xef   : > { %1724 = vmatprep.mubr.msk.bf16.mxu0 %vm459_vm0, %v602_v42  ;;  %1748 = vmatprep.mubr.msk.bf16.mxu1 %vm459_vm0, %v602_v42 }
  0xf0   : > { %v605_v54 = vpack.c.bf16 %v597_v53, %v596_v52 }
  0xf6   : > { %1725 = vmatmul.mubr.msk.bf16.gmra.mxu0 %vm459_vm0, %v603_v31  ;;  %1749 = vmatmul.mubr.msk.bf16.gmra.mxu1 %vm459_vm0, %v603_v31 }
  0xf7   : > { %1728 = vmatprep.mubr.msk.bf16.mxu0 %vm459_vm0, %v604_v37  ;;  %1752 = vmatprep.mubr.msk.bf16.mxu1 %vm459_vm0, %v604_v37 }
  0xfe   : > { %1729 = vmatmul.mubr.msk.bf16.gmra.mxu0 %vm459_vm0, %v605_v54  ;;  %1753 = vmatmul.mubr.msk.bf16.gmra.mxu1 %vm459_vm0, %v605_v54 }
 0x1a6   : > { %v1718_v44 = vpop.f32.mrf.mxu0  ;;  %v1742_v55 = vpop.f32.mrf.mxu1 }
 0x1a7   : > { %v2469_v56 = vadd.f32 %v1742_v55, %v2466_v43  ;;  %v2512_v33 = vadd.f32 %v1718_v44, %v2505_v27 }
 0x1a8   : > { %v703_v57 = vpop.f32.mrf.mxu0  ;;  %v951_v58 = vpop.f32.mrf.mxu1 }
 0x1a9   : > { %v1648_v59 = vmul.f32 -1.442695, %v2469_v56  ;;  %v2473_v60 = vadd.f32 %v2466_v43, %v951_v58  ;;  %v2515_v40 = vadd.f32 %v2505_v27, %v703_v57  ;;  %v1619_v20 = vmul.f32 -1.442695, %v2512_v33 }
 0x1aa   : > { %v1719_v61 = vpop.f32.mrf.mxu0  ;;  %v1743_v62 = vpop.f32.mrf.mxu1  ;;  %v1129_v58 = vsub.s32 6, %v1128_v32 }
 0x1ab   : > { %v1646_v63 = vmul.f32 -1.442695, %v2473_v60  ;;  %1921 = vpow2.f32 %v1648_v59  ;;  %v2477_v0 = vadd.f32 %v1743_v62, %v2466_v43  ;;  %v2518_v41 = vadd.f32 %v1719_v61, %v2505_v27  ;;  %v1126_v61 = vld [vmem:[%s2911_s6] sm:$0xff] }
 0x1ac   : > { %v706_v1 = vpop.f32.mrf.mxu0  ;;  %v954_v5 = vpop.f32.mrf.mxu1  ;;  %v1617_v50 = vmul.f32 -1.442695, %v2515_v40 }
 0x1ad   : > { %v2480_v6 = vadd.f32 %v2466_v43, %v954_v5  ;;  %1923 = vpow2.f32 %v1646_v63  ;;  %v1649_v7 = vmul.f32 -1.442695, %v2477_v0  ;;  %v2522_v46 = vadd.f32 %v2505_v27, %v706_v1 }
 0x1ae   : > { %v1722_v9 = vpop.f32.mrf.mxu0  ;;  %v1746_v10 = vpop.f32.mrf.mxu1  ;;  %v1620_v51 = vmul.f32 -1.442695, %v2518_v41  ;;  %v1149_v1 = vsub.s32 7, %v1128_v32 }
 0x1af   : > { %v1647_v13 = vmul.f32 -1.442695, %v2480_v6  ;;  %1925 = vpow2.f32 %v1649_v7  ;;  %v2485_v14 = vadd.f32 %v1746_v10, %v2466_v43  ;;  %v2526_v31 = vadd.f32 %v1722_v9, %v2505_v27 }
 0x1b0   : > { %v719_v15 = vpop.f32.mrf.mxu0  ;;  %v967_v16 = vpop.f32.mrf.mxu1  ;;  %v1618_v53 = vmul.f32 -1.442695, %v2522_v46 }
 0x1b1   : > { %v2488_v17 = vadd.f32 %v2466_v43, %v967_v16  ;;  %1927 = vpow2.f32 %v1647_v13  ;;  %v1652_v18 = vmul.f32 -1.442695, %v2485_v14  ;;  %v2530_v37 = vadd.f32 %v2505_v27, %v719_v15 }
 0x1b2   : > { %v2491_v22 = vpop.f32.mrf.mxu0  ;;  %v1747_v23 = vpop.f32.mrf.mxu1  ;;  %v1623_v59 = vmul.f32 -1.442695, %v2526_v31 }
 0x1b3   : > { %v1650_v4 = vmul.f32 -1.442695, %v2488_v17  ;;  %1929 = vpow2.f32 %v1652_v18  ;;  %v2495_v24 = vadd.f32 %v1747_v23, %v2466_v43  ;;  %v1621_v62 = vmul.f32 -1.442695, %v2530_v37 }
 0x1b4   : > { %v2497_v11 = vpop.f32.mrf.mxu0  ;;  %v970_v25 = vpop.f32.mrf.mxu1 }
 0x1b5   : > { %v2500_v3 = vadd.f32 %v2466_v43, %v970_v25  ;;  %1931 = vpow2.f32 %v1650_v4  ;;  %v1653_v2 = vmul.f32 -1.442695, %v2495_v24  ;;  %v2550_v4 = vrot.slane %v1126_v61, %v1129_v58 }
 0x1b6   : > { %v1726_v8 = vpop.f32.mrf.mxu0  ;;  %v1750_v12 = vpop.f32.mrf.mxu1 }
 0x1b7   : > { %v1651_v28 = vmul.f32 -1.442695, %v2500_v3  ;;  %1933 = vpow2.f32 %v1653_v2  ;;  %v2539_v63 = vadd.f32 %v1750_v12, %v2466_v43  ;;  %v2542_v9 = vadd.f32 %v1726_v8, %v2505_v27 }
 0x1b8   : > { %v2509_v29 = vpop.f32.mrf.mxu0  ;;  %v983_v30 = vpop.f32.mrf.mxu1  ;;  %v2556_v12 = vrot.slane %v1126_v61, %v1149_v1 }
 0x1b9   : > { %v1922_v19 = vpop.eup %1921  ;;  %1935 = vpow2.f32 %v1651_v28  ;;  %v2545_v13 = vadd.f32 %v2466_v43, %v983_v30  ;;  %v1656_v8 = vmul.f32 -1.442695, %v2539_v63  ;;  %v1627_v30 = vmul.f32 -1.442695, %v2542_v9 }
 0x1ba   : > { %v1064_v34 = vadd.f32 1.0, %v1922_v19  ;;  %v1727_v35 = vpop.f32.mrf.mxu0  ;;  %v1751_v36 = vpop.f32.mrf.mxu1 }
 0x1bb   : > { %v1924_v39 = vpop.eup %1923  ;;  %v2548_v15 = vadd.f32 %v1727_v35, %v2505_v27  ;;  %v2553_v25 = vadd.f32 %v1751_v36, %v2466_v43  ;;  %v1654_v36 = vmul.f32 -1.442695, %v2545_v13 }
 0x1bc   : > { %1937 = vrcp.f32 %v1064_v34  ;;  %v1062_v21 = vadd.f32 1.0, %v1924_v39  ;;  %v1926_v42 = vpop.eup %1925  ;;  %v738_v47 = vpop.f32.mrf.mxu0 }
 0x1bd   : > { %v1065_v45 = vadd.f32 1.0, %v1926_v42  ;;  %v986_v48 = vpop.f32.mrf.mxu1  ;;  %v2560_v19 = vadd.f32 %v2505_v27, %v738_v47  ;;  %v1628_v39 = vmul.f32 -1.442695, %v2548_v15 }
 0x1be   : > { %1939 = vrcp.f32 %v1062_v21  ;;  %v1928_v49 = vpop.eup %1927  ;;  %v1730_v44 = vpop.f32.mrf.mxu0  ;;  %v2563_v34 = vadd.f32 %v2466_v43, %v986_v48 }
 0x1bf   : > { %1941 = vrcp.f32 %v1065_v45  ;;  %v1063_v38 = vadd.f32 1.0, %v1928_v49  ;;  %v1754_v55 = vpop.f32.mrf.mxu1  ;;  %v2570_v45 = vadd.f32 %v1730_v44, %v2505_v27 }
 0x1c0   : > { %v1930_v52 = vpop.eup %1929  ;;  %1943 = vpow2.f32 %v1619_v20  ;;  %v751_v16 = vpop.f32.mrf.mxu0  ;;  %v1657_v20 = vmul.f32 -1.442695, %v2553_v25  ;;  %v2573_v47 = vadd.f32 %v1754_v55, %v2466_v43 }
 0x1c1   : > { %1945 = vrcp.f32 %v1063_v38  ;;  %v1068_v54 = vadd.f32 1.0, %v1930_v52  ;;  %v999_v18 = vpop.f32.mrf.mxu1  ;;  %v2578_v49 = vadd.f32 %v2505_v27, %v751_v16  ;;  %v1631_v58 = vmul.f32 -1.442695, %v2570_v45 }
 0x1c2   : > { %v1932_v57 = vpop.eup %1931  ;;  %1947 = vpow2.f32 %v1617_v50  ;;  %v1731_v26 = vpop.f32.mrf.mxu0  ;;  %v1626_v50 = vmul.f32 -1.442695, %v2560_v19  ;;  %v2583_v38 = vadd.f32 %v2466_v43, %v999_v18 }
 0x1c3   : > { %1949 = vpow2.f32 %v1620_v51  ;;  %v1066_v7 = vadd.f32 1.0, %v1932_v57  ;;  %v1755_v21 = vpop.f32.mrf.mxu1  ;;  %v1655_v51 = vmul.f32 -1.442695, %v2563_v34 }
 0x1c4   : > { %v1934_v5 = vpop.eup %1933  ;;  %1951 = vrcp.f32 %v1068_v54  ;;  %v2601_v1 = vadd.f32 %v1755_v21, %v2466_v43 }
 0x1c5   : > { %1953 = vpow2.f32 %v1618_v53  ;;  %v1069_v10 = vadd.f32 1.0, %v1934_v5  ;;  %v1002_v44 = vpop.f32.mrf.mxu1 }
 0x1c6   : > { %v1936_v23 = vpop.eup %1935  ;;  %1955 = vpow2.f32 %v1623_v59  ;;  %v2594_v59 = vadd.f32 %v1731_v26, %v2505_v27  ;;  %v2612_v16 = vadd.f32 %v2466_v43, %v1002_v44  ;;  %v2636_v26 = vadd.f32 %v2491_v22, %v2505_v27 }
 0x1c7   : > { %1957 = vpow2.f32 %v1621_v62  ;;  %v1067_v2 = vadd.f32 1.0, %v1936_v23  ;;  %v1660_v62 = vmul.f32 -1.442695, %v2573_v47 }
 0x1c8   : > { %1959 = vrcp.f32 %v1066_v7  ;;  %v1658_v7 = vmul.f32 -1.442695, %v2583_v38 }
 0x1c9   : > { %v1938_v28 = vpop.eup %1937  ;;  %1961 = vrcp.f32 %v1069_v10 }
 0x1ca   : > { %v1112_v35 = vmul.f32 %v1938_v28, %v2469_v56  ;;  %1963 = vrcp.f32 %v1067_v2 }
 0x1cb   : > { %v1940_v42 = vpop.eup %1939  ;;  %1965 = vpow2.f32 %v1656_v8 }
 0x1cc   : > { %v1133_v48 = vmul.f32 %v2550_v4, %v1112_v35  ;;  %v1110_v56 = vmul.f32 %v1940_v42, %v2473_v60  ;;  %v1942_v32 = vpop.eup %1941  ;;  %1967 = vpow2.f32 %v1627_v30  ;;  %v754_v60 = vpop.f32.mrf.mxu0  ;;  %v2623_v30 = vadd.f32 %v2505_v27, %v2509_v29 }
 0x1cd   : > { %v2585_v52 = vpop.eup %1943  ;;  %v1113_v54 = vmul.f32 %v1942_v32, %v2477_v0  ;;  %1969 = vpow2.f32 %v1654_v36  ;;  %v1629_v0 = vmul.f32 -1.442695, %v2578_v49  ;;  %v2609_v10 = vadd.f32 %v2505_v27, %v754_v60 }
 0x1ce   : > { %v1131_v53 = vmul.f32 %v2550_v4, %v1110_v56  ;;  %v2590_v55 = vadd.f32 %v2556_v12, %v1133_v48  ;;  %v1946_v57 = vpop.eup %1945  ;;  %1971 = vpow2.f32 %v1628_v39  ;;  %v1632_v35 = vmul.f32 -1.442695, %v2594_v59 }
 0x1cf   : > { %v2596_v61 = vpop.eup %1947  ;;  %1973 = vpow2.f32 %v1657_v20  ;;  %v1134_v23 = vmul.f32 %v2550_v4, %v1113_v54  ;;  %v1111_v2 = vmul.f32 %v1946_v57, %v2480_v6  ;;  %v1661_v36 = vmul.f32 -1.442695, %v2601_v1 }
 0x1d0   : > { %1219 = vrot.lane.b32.xlu1 %v2590_v55, %s2145_s28  ;;  %v2605_v5 = vpop.eup %1949  ;;  %1975 = vpow2.f32 %v1626_v50  ;;  %v2617_v8 = vadd.f32 %v2556_v12, %v1131_v53  ;;  %v1630_v29 = vmul.f32 -1.442695, %v2609_v10  ;;  %v1659_v20 = vmul.f32 -1.442695, %v2612_v16 }
 0x1d1   : > { %v1952_v18 = vpop.eup %1951  ;;  %1977 = vpow2.f32 %v1655_v51  ;;  %v1132_v42 = vmul.f32 %v2550_v4, %v1111_v2  ;;  %v2642_v48 = vadd.f32 %v2556_v12, %v1134_v23  ;;  %v1625_v22 = vmul.f32 -1.442695, %v2623_v30 }
 0x1d2   : > { %v2619_v28 = vpop.eup %1953  ;;  %1979 = vpow2.f32 %v1631_v58  ;;  %v1116_v39 = vmul.f32 %v1952_v18, %v2485_v14  ;;  %v2646_v14 = vadd.f32 %v2505_v27, %v2497_v11  ;;  %v1624_v53 = vmul.f32 -1.442695, %v2636_v26 }
 0x1d3   : > { %v2626_v43 = vpop.eup %1955  ;;  %1981 = vpow2.f32 %v1660_v62  ;;  %v2655_v11 = vadd.f32 %v2556_v12, %v1132_v42 }
 0x1d4   : > { %1215 = vrot.lane.b32.xlu1 %v2617_v8, %s2145_s28  ;;  %v2631_v6 = vpop.eup %1957  ;;  %1983 = vpow2.f32 %v1629_v0  ;;  %v1137_v51 = vmul.f32 %v2550_v4, %v1116_v39  ;;  %v1622_v57 = vmul.f32 -1.442695, %v2646_v14 }
 0x1d5   : > { %v1960_v21 = vpop.eup %1959  ;;  %1985 = vpow2.f32 %v1658_v7 }
 0x1d6   : > { %v1962_v56 = vpop.eup %1961  ;;  %1987 = vpow2.f32 %v1632_v35  ;;  %v1114_v60 = vmul.f32 %v1960_v21, %v2488_v17  ;;  %v2663_v35 = vadd.f32 %v2556_v12, %v1137_v51 }
 0x1d7   : > { %v1964_v32 = vpop.eup %1963  ;;  %1989 = vpow2.f32 %v1661_v36  ;;  %v1117_v7 = vmul.f32 %v1962_v56, %v2495_v24 }
 0x1d8   : > { %1221 = vrot.lane.b32.xlu1 %v2642_v48, %s2145_s28  ;;  %v1966_v50 = vpop.eup %1965  ;;  %1991 = vpow2.f32 %v1630_v29  ;;  %v1135_v23 = vmul.f32 %v2550_v4, %v1114_v60  ;;  %v1115_v56 = vmul.f32 %v1964_v32, %v2500_v3 }
 0x1d9   : > { %v1968_v54 = vpop.eup %1967  ;;  %v1072_v44 = vadd.f32 1.0, %v1966_v50  ;;  %1993 = vpow2.f32 %v1659_v20  ;;  %v1138_v24 = vmul.f32 %v2550_v4, %v1117_v7 }
 0x1da   : > { %v1970_v27 = vpop.eup %1969  ;;  %1995 = vpow2.f32 %v1625_v22  ;;  %v2670_v50 = vadd.f32 %v2556_v12, %v1135_v23  ;;  %v1136_v3 = vmul.f32 %v2550_v4, %v1115_v56  ;;  %v824_v7 = vadd.f32 1.0, %v1968_v54 }
 0x1db   : > { %v1972_v58 = vpop.eup %1971  ;;  %1997 = vrcp.f32 %v1072_v44  ;;  %v1070_v62 = vadd.f32 1.0, %v1970_v27 }
 0x1dc   : > { %1217 = vrot.lane.b32.xlu1 %v2655_v11, %s2145_s28  ;;  %v1974_v0 = vpop.eup %1973  ;;  %1999 = vpow2.f32 %v1624_v53  ;;  %v825_v17 = vadd.f32 1.0, %v1972_v58 }
 0x1dd   : > { %v1976_v18 = vpop.eup %1975  ;;  %2001 = vrcp.f32 %v1070_v62  ;;  %v1073_v2 = vadd.f32 1.0, %v1974_v0  ;;  %v2676_v62 = vadd.f32 %v2556_v12, %v1138_v24  ;;  %v2682_v24 = vadd.f32 %v2556_v12, %v1136_v3 }
 0x1de   : > { %v1978_v36 = vpop.eup %1977  ;;  %2003 = vpow2.f32 %v1622_v57 }
 0x1df   : > { %v1980_v39 = vpop.eup %1979  ;;  %2005 = vrcp.f32 %v1073_v2  ;;  %v1071_v29 = vadd.f32 1.0, %v1978_v36 }
 0x1e0   : > { %1227 = vrot.lane.b32.xlu1 %v2663_v35, %s2145_s28  ;;  %v1982_v21 = vpop.eup %1981  ;;  %2007 = vrcp.f32 %v825_v17  ;;  %v828_v42 = vadd.f32 1.0, %v1980_v39  ;;  %v823_v39 = vadd.f32 1.0, %v1976_v18 }
 0x1e1   : > { %v1984_v20 = vpop.eup %1983  ;;  %2009 = vrcp.f32 %v1071_v29  ;;  %v1076_v22 = vadd.f32 1.0, %v1982_v21 }
 0x1e2   : > { %v1986_v51 = vpop.eup %1985  ;;  %2011 = vrcp.f32 %v828_v42  ;;  %v826_v53 = vadd.f32 1.0, %v1984_v20 }
 0x1e3   : > { %v1988_v60 = vpop.eup %1987  ;;  %2013 = vrcp.f32 %v1076_v22  ;;  %v1074_v44 = vadd.f32 1.0, %v1986_v51 }
 0x1e4   : > { %1223 = vrot.lane.b32.xlu1 %v2670_v50, %s2145_s28  ;;  %v1990_v27 = vpop.eup %1989  ;;  %2015 = vrcp.f32 %v826_v53  ;;  %v829_v57 = vadd.f32 1.0, %v1988_v60 }
 0x1e5   : > { %v1992_v58 = vpop.eup %1991  ;;  %2017 = vrcp.f32 %v1074_v44  ;;  %v1077_v32 = vadd.f32 1.0, %v1990_v27 }
 0x1e6   : > { %v1994_v0 = vpop.eup %1993  ;;  %2019 = vrcp.f32 %v829_v57  ;;  %v827_v17 = vadd.f32 1.0, %v1992_v58  ;;  %v820_v57 = vadd.f32 1.0, %v2626_v43 }
 0x1e7   : > { %v1996_v23 = vpop.eup %1995  ;;  %2021 = vrcp.f32 %v1077_v32  ;;  %v1075_v2 = vadd.f32 1.0, %v1994_v0 }
 0x1e8   : > { %1229 = vrot.lane.b32.xlu1 %v2676_v62, %s2145_s28  ;;  %v1998_v36 = vpop.eup %1997  ;;  %2023 = vrcp.f32 %v827_v17  ;;  %v822_v54 = vadd.f32 1.0, %v1996_v23 }
 0x1e9   : > { %v2000_v29 = vpop.eup %1999  ;;  %v1120_v21 = vmul.f32 %v1998_v36, %v2539_v63  ;;  %2025 = vrcp.f32 %v1075_v2  ;;  %v818_v2 = vadd.f32 1.0, %v2631_v6 }
 0x1ea   : > { %v2002_v42 = vpop.eup %2001  ;;  %2027 = vrcp.f32 %v824_v7  ;;  %v821_v51 = vadd.f32 1.0, %v2000_v29 }
 0x1eb   : > { %v2004_v20 = vpop.eup %2003  ;;  %v1141_v56 = vmul.f32 %v2550_v4, %v1120_v21  ;;  %v1118_v22 = vmul.f32 %v2002_v42, %v2545_v13  ;;  %2029 = vrcp.f32 %v823_v39  ;;  %v817_v21 = vadd.f32 1.0, %v2605_v5 }
 0x1ec   : > { %1225 = vrot.lane.b32.xlu1 %v2682_v24, %s2145_s28  ;;  %v2006_v18 = vpop.eup %2005  ;;  %2031 = vrcp.f32 %v822_v54  ;;  %v819_v0 = vadd.f32 1.0, %v2004_v20  ;;  %v816_v20 = vadd.f32 1.0, %v2585_v52  ;;  %v815_v52 = vadd.f32 1.0, %v2619_v28 }
 0x1ed   : > { %v2008_v53 = vpop.eup %2007  ;;  %v1139_v63 = vmul.f32 %v2550_v4, %v1118_v22  ;;  %v1121_v60 = vmul.f32 %v2006_v18, %v2553_v25  ;;  %v2691_v44 = vadd.f32 %v2556_v12, %v1141_v56  ;;  %2033 = vrcp.f32 %v821_v51 }
 0x1ee   : > { %v2010_v27 = vpop.eup %2009  ;;  %2035 = vrcp.f32 %v820_v57 }
 0x1ef   : > { %v2012_v58 = vpop.eup %2011  ;;  %v1142_v13 = vmul.f32 %v2550_v4, %v1121_v60  ;;  %v1119_v3 = vmul.f32 %v2010_v27, %v2563_v34  ;;  %1235 = vrot.lane.b32.xlu0 %v2691_v44, %s2145_s28  ;;  %v2700_v17 = vadd.f32 %v2556_v12, %v1139_v63  ;;  %2037 = vrcp.f32 %v819_v0 }
 0x1f0   : > { %v2014_v32 = vpop.eup %2013  ;;  %v876_v42 = vmul.f32 %v2012_v58, %v2570_v45  ;;  %2039 = vrcp.f32 %v818_v2  ;;  %v873_v60 = vmul.f32 %v2008_v53, %v2548_v15 }
 0x1f1   : > { %v2016_v7 = vpop.eup %2015  ;;  %v1140_v25 = vmul.f32 %v2550_v4, %v1119_v3  ;;  %v2703_v43 = vadd.f32 %v2556_v12, %v1142_v13  ;;  %v1124_v36 = vmul.f32 %v2014_v32, %v2573_v47  ;;  %2041 = vrcp.f32 %v817_v21 }
 0x1f2   : > { %v2018_v23 = vpop.eup %2017  ;;  %v874_v22 = vmul.f32 %v2016_v7, %v2578_v49  ;;  %2043 = vrcp.f32 %v816_v20  ;;  %v1186_v20 = vld [vmem:[%s2290_s23 + $0x18] sm:$0xff] }
 0x1f3   : > { %v2020_v34 = vpop.eup %2019  ;;  %v1122_v39 = vmul.f32 %v2018_v23, %v2583_v38  ;;  %1231 = vrot.lane.b32.xlu0 %v2700_v17, %s2145_s28  ;;  %1237 = vrot.lane.b32.xlu1 %v2703_v43, %s2145_s28  ;;  %v2718_v38 = vadd.f32 %v2556_v12, %v1140_v25  ;;  %v1145_v45 = vmul.f32 %v2550_v4, %v1124_v36  ;;  %2045 = vrcp.f32 %v815_v52  ;;  %v1184_v52 = vld [vmem:[%s2290_s23 + $0x8] sm:$0xff] }
 0x1f4   : > { %v2022_v29 = vpop.eup %2021  ;;  %v877_v54 = vmul.f32 %v2020_v34, %v2594_v59 }
 0x1f5   : > { %v2024_v6 = vpop.eup %2023  ;;  %v1143_v47 = vmul.f32 %v2550_v4, %v1122_v39  ;;  %v1125_v27 = vmul.f32 %v2022_v29, %v2601_v1  ;;  %v2738_v28 = vadd.f32 %v2556_v12, %v1145_v45  ;;  %v1183_v45 = vld [vmem:[%s2290_s23] sm:$0xff] }
 0x1f6   : > { %v2026_v56 = vpop.eup %2025  ;;  %v1294_v18 = vpack.c.bf16 %v877_v54, %v876_v42  ;;  %v875_v5 = vmul.f32 %v2024_v6, %v2609_v10  ;;  %v1185_v6 = vld [vmem:[%s2290_s23 + $0x10] sm:$0xff] }
 0x1f7   : > { %v2028_v51 = vpop.eup %2027  ;;  %v1123_v59 = vmul.f32 %v2026_v56, %v2612_v16  ;;  %v2725_v63 = vadd.f32 %v2556_v12, %v1143_v47  ;;  %1233 = vrot.lane.b32.xlu1 %v2718_v38, %s2145_s28  ;;  %v814_v16 = vadd.f32 1.0, %v2596_v61  ;;  %v1146_v3 = vmul.f32 %v2550_v4, %v1125_v27  ;;  %v1167_v56 = vld [vmem:[%s2280_s20] sm:$0xff] }
 0x1f8   : > { %v1293_v49 = vpack.c.bf16 %v875_v5, %v874_v22  ;;  %1756 = vmatprep.subr.bf16.mxu0 %v1294_v18  ;;  %1788 = vmatprep.subr.bf16.mxu1 %v1294_v18  ;;  %v2030_v10 = vpop.eup %2029  ;;  %v872_v58 = vmul.f32 %v2028_v51, %v2542_v9  ;;  %v1202_v5 = vmul.f32 %v1186_v20, %v2642_v48 }
 0x1f9   : > { %v1144_v57 = vmul.f32 %v2550_v4, %v1123_v59  ;;  %1239 = vrot.lane.b32.xlu0 %v2725_v63, %s2145_s28  ;;  %1757 = vmatpush3.bf16.msra.mxu0 %v1294_v18  ;;  %v2032_v15 = vpop.eup %2031  ;;  %v871_v53 = vmul.f32 %v2030_v10, %v2560_v19  ;;  %2047 = vrcp.f32 %v814_v16  ;;  %v2752_v7 = vadd.f32 %v2556_v12, %v1146_v3  ;;  %v1168_v59 = vld [vmem:[%s2280_s20 + $0x8] sm:$0xff] }
 0x1fa   : > { %1796 = vmatpush3.bf16.msra.mxu1 %v1294_v18  ;;  %1758 = vmatprep.subr.bf16.mxu0 %v1293_v49  ;;  %v1292_v1 = vpack.c.bf16 %v873_v60, %v872_v58  ;;  %v2034_v13 = vpop.eup %2033  ;;  %v870_v61 = vmul.f32 %v2032_v15, %v2623_v30  ;;  %v1201_v18 = vmul.f32 %v1185_v6, %v2590_v55 }
 0x1fb   : > { %1789 = vmatprep.subr.bf16.mxu1 %v1293_v49  ;;  %v2745_v9 = vadd.f32 %v2556_v12, %v1144_v57  ;;  %v2036_v32 = vpop.eup %2035  ;;  %v869_v19 = vmul.f32 %v2034_v13, %v2636_v26  ;;  %v1199_v57 = vmul.f32 %v1183_v45, %v2617_v8  ;;  %v1200_v55 = vmul.f32 %v1184_v52, %v2655_v11  ;;  %v1173_v13 = vld [vmem:[%s2280_s20 + $0x30] sm:$0xff]  ;;  %v1171_v8 = vld [vmem:[%s2280_s20 + $0x20] sm:$0xff] }
 0x1fc   : > { %v1291_v4 = vpack.c.bf16 %v871_v53, %v870_v61  ;;  %v2038_v0 = vpop.eup %2037  ;;  %v868_v25 = vmul.f32 %v2036_v32, %v2526_v31  ;;  %v1189_v61 = vld [vmem:[%s2290_s23 + $0x30] sm:$0xff]  ;;  %v1174_v32 = vld [vmem:[%s2280_s20 + $0x38] sm:$0xff] }
 0x1fd   : > { %1243 = vrot.lane.b32.xlu0 %v2738_v28, %s2145_s28  ;;  %1759 = vmatpush3.bf16.msra.mxu0 %v1293_v49  ;;  %v2040_v30 = vpop.eup %2039  ;;  %v867_v2 = vmul.f32 %v2038_v0, %v2646_v14  ;;  %v1205_v11 = vmul.f32 %v1189_v61, %v2663_v35 }
 0x1fe   : > { %1797 = vmatpush3.bf16.msra.mxu1 %v1293_v49  ;;  %1760 = vmatprep.subr.bf16.mxu0 %v1292_v1  ;;  %v1290_v23 = vpack.c.bf16 %v869_v19, %v868_v25  ;;  %v2042_v34 = vpop.eup %2041  ;;  %v866_v26 = vmul.f32 %v2040_v30, %v2530_v37  ;;  %v1190_v19 = vld [vmem:[%s2290_s23 + $0x38] sm:$0xff] }
 0x1ff   : > { %1790 = vmatprep.subr.bf16.mxu1 %v1292_v1  ;;  %1241 = vrot.lane.b32.xlu1 %v2745_v9, %s2145_s28  ;;  %v2044_v12 = vpop.eup %2043  ;;  %v865_v31 = vmul.f32 %v2042_v34, %v2518_v41  ;;  %v1206_v25 = vmul.f32 %v1190_v19, %v2676_v62  ;;  %v1188_v34 = vld [vmem:[%s2290_s23 + $0x28] sm:$0xff]  ;;  %v1182_v19 = vld [vmem:[%s2280_s20 + $0x78] sm:$0xff] }
 0x200   : > { %v1289_v36 = vpack.c.bf16 %v867_v2, %v866_v26  ;;  %v2046_v39 = vpop.eup %2045  ;;  %v864_v29 = vmul.f32 %v2044_v12, %v2512_v33  ;;  %v1172_v2 = vld [vmem:[%s2280_s20 + $0x28] sm:$0xff]  ;;  %v1204_v35 = vmul.f32 %v1188_v34, %v2682_v24 }
 0x201   : > { %1761 = vmatpush3.bf16.msra.mxu0 %v1292_v1  ;;  %v863_v42 = vmul.f32 %v2046_v39, %v2522_v46  ;;  %v1169_v46 = vld [vmem:[%s2280_s20 + $0x10] sm:$0xff] }
 0x202   : > { %1798 = vmatpush3.bf16.msra.mxu1 %v1292_v1  ;;  %1762 = vmatprep.subr.bf16.mxu0 %v1291_v4  ;;  %v1288_v14 = vpack.c.bf16 %v865_v31, %v864_v29 }
 0x203   : > { %1791 = vmatprep.subr.bf16.mxu1 %v1291_v4  ;;  %1245 = vrot.lane.b32.xlu1 %v2752_v7, %s2145_s28 }
 0x205   : > { %1763 = vmatpush3.bf16.msra.mxu0 %v1291_v4 }
 0x206   : > { %1799 = vmatpush3.bf16.msra.mxu1 %v1291_v4  ;;  %1764 = vmatprep.subr.bf16.mxu0 %v1290_v23  ;;  %v2048_v21 = vpop.eup %2047 }
 0x207   : > { %1792 = vmatprep.subr.bf16.mxu1 %v1290_v23  ;;  %v862_v37 = vmul.f32 %v2048_v21, %v2515_v40  ;;  %v1170_v40 = vld [vmem:[%s2280_s20 + $0x18] sm:$0xff] }
 0x209   : > { %1765 = vmatpush3.bf16.msra.mxu0 %v1290_v23  ;;  %v1287_v41 = vpack.c.bf16 %v863_v42, %v862_v37  ;;  %v1177_v42 = vld [vmem:[%s2280_s20 + $0x50] sm:$0xff] }
 0x20a   : > { %1800 = vmatpush3.bf16.msra.mxu1 %v1290_v23  ;;  %1766 = vmatprep.subr.bf16.mxu0 %v1289_v36  ;;  %v1187_v23 = vld [vmem:[%s2290_s23 + $0x20] sm:$0xff] }
 0x20b   : > { %1793 = vmatprep.subr.bf16.mxu1 %v1289_v36  ;;  %v1203_v39 = vmul.f32 %v1187_v23, %v2670_v50 }
 0x20d   : > { %1767 = vmatpush3.bf16.msra.mxu0 %v1289_v36 }
 0x20e   : > { %1801 = vmatpush3.bf16.msra.mxu1 %v1289_v36  ;;  %1768 = vmatprep.subr.bf16.mxu0 %v1288_v14 }
 0x20f   : > { %1794 = vmatprep.subr.bf16.mxu1 %v1288_v14 }
 0x211   : > { %1769 = vmatpush3.bf16.msra.mxu0 %v1288_v14 }
 0x212   : > { %1802 = vmatpush3.bf16.msra.mxu1 %v1288_v14  ;;  %1770 = vmatprep.subr.bf16.mxu0 %v1287_v41 }
 0x213   : > { %1795 = vmatprep.subr.bf16.mxu1 %v1287_v41 }
 0x215   : > { %1771 = vmatpush3.bf16.msra.mxu0 %v1287_v41 }
 0x216   : > { %1803 = vmatpush3.bf16.msra.mxu1 %v1287_v41 }
 0x242   : > { %v1220_v33 = vpop.permute.xlu1 %1219 }
 0x243   : > { %v1249_v47 = vmul.f32 %v1220_v33, %v1169_v46  ;;  %v1193_v33 = vld [vmem:[%s2290_s23 + $0x50] sm:$0xff]  ;;  %v1178_v46 = vld [vmem:[%s2280_s20 + $0x58] sm:$0xff] }
 0x245   : > { %v1265_v60 = vadd.f32 %v1249_v47, %v1201_v18  ;;  %v1209_v47 = vmul.f32 %v1193_v33, %v2691_v44  ;;  %v1176_v18 = vld [vmem:[%s2280_s20 + $0x48] sm:$0xff] }
 0x246   : > { %v1216_v54 = vpop.permute.xlu1 %1215 }
 0x247   : > { %v1247_v49 = vmul.f32 %v1216_v54, %v1167_v56  ;;  %v1194_v54 = vld [vmem:[%s2290_s23 + $0x58] sm:$0xff] }
 0x248   : > { %v1210_v24 = vmul.f32 %v1194_v54, %v2703_v43  ;;  %v1411_v54 = vld [vmem:[%s2292_s11 + $0x18] sm:$0xff] }
 0x249   : > { %v1263_v48 = vadd.f32 %v1247_v49, %v1199_v57 }
 0x24a   : > { %v1222_v22 = vpop.permute.xlu1 %1221 }
 0x24b   : > { %v1250_v51 = vmul.f32 %v1222_v22, %v1170_v40  ;;  %v1175_v40 = vld [vmem:[%s2280_s20 + $0x40] sm:$0xff] }
 0x24c   : > { %v1191_v22 = vld [vmem:[%s2290_s23 + $0x40] sm:$0xff] }
 0x24d   : > { %v1266_v10 = vadd.f32 %v1250_v51, %v1202_v5  ;;  %v1192_v5 = vld [vmem:[%s2290_s23 + $0x48] sm:$0xff] }
 0x24e   : > { %v1218_v27 = vpop.permute.xlu1 %1217  ;;  %v1208_v44 = vmul.f32 %v1192_v5, %v2718_v38 }
 0x24f   : > { %v1280_v16 = vpack.c.bf16 %v1266_v10, %v1265_v60  ;;  %v1248_v58 = vmul.f32 %v1218_v27, %v1168_v59  ;;  %v1207_v60 = vmul.f32 %v1191_v22, %v2700_v17  ;;  %v1414_v22 = vld [vmem:[%s2292_s11 + $0x30] sm:$0xff] }
 0x251   : > { %v1264_v15 = vadd.f32 %v1248_v58, %v1200_v55  ;;  %v1195_v58 = vld [vmem:[%s2290_s23 + $0x60] sm:$0xff] }
 0x252   : > { %v1228_v1 = vpop.permute.xlu1 %1227 }
 0x253   : > { %v1279_v53 = vpack.c.bf16 %v1264_v15, %v1263_v48  ;;  %v1253_v4 = vmul.f32 %v1228_v1, %v1173_v13  ;;  %v1180_v48 = vld [vmem:[%s2280_s20 + $0x68] sm:$0xff] }
 0x254   : > { %v1196_v15 = vld [vmem:[%s2290_s23 + $0x68] sm:$0xff] }
 0x255   : > { %1295 = vxpose.xlu0.c.b16.start [1/8] %v1279_v53, 128  ;;  %v1269_v26 = vadd.f32 %v1253_v4, %v1205_v11  ;;  %v1181_v53 = vld [vmem:[%s2280_s20 + $0x70] sm:$0xff]  ;;  %v1212_v38 = vmul.f32 %v1196_v15, %v2745_v9  ;;  %v1198_v4 = vld [vmem:[%s2290_s23 + $0x78] sm:$0xff] }
 0x256   : > { %v1224_v3 = vpop.permute.xlu1 %1223 }
 0x257   : > { %v1251_v12 = vmul.f32 %v1224_v3, %v1171_v8  ;;  %v1211_v3 = vmul.f32 %v1195_v58, %v2725_v63  ;;  %v1418_v58 = vld [vmem:[%s2292_s11 + $0x50] sm:$0xff] }
 0x259   : > { %1296 = vxpose.xlu0.c.b16.cont [2/8] %v1280_v16, 128  ;;  %v1267_v14 = vadd.f32 %v1251_v12, %v1203_v39  ;;  %v1179_v16 = vld [vmem:[%s2280_s20 + $0x60] sm:$0xff]  ;;  %s1667_s20 = sshll.u32 %s2129_s15, 11  ;;  %s2932_s15 = sand.u32 1, %s2117_s12  }
 0x25a   : > { %v1230_v0 = vpop.permute.xlu1 %1229  ;;  %s2846_s10 = scalar_lea.hbm %s2914_s9, %s1667_s20  ;;  %s2854_s1 = scalar_lea.sflag [#allocation4], %s2932_s15 }
 0x25b   : > { %v1254_v30 = vmul.f32 %v1230_v0, %v1174_v32  ;;  %v1197_v32 = vld [vmem:[%s2290_s23 + $0x70] sm:$0xff]  ;;  %s1486_s23 = sshll.u32 %s2292_s11, 4  ;;  %s2848_s23 = int_to_ptr.vmem [resolvable:$true] %s1486_s23 }
 0x25c   : > { %s2049_s19 = scalar_lea.vmem %s2848_s23, 2048  ;;  %p2056_p5 = scmp.lt.s32.totalorder %s2848_s23, %s2054_s25 }
 0x25d   : > { %v1270_v31 = vadd.f32 %v1254_v30, %v1206_v25  ;;  %v1213_v30 = vmul.f32 %v1197_v32, %v2738_v28  ;;  %p2050_p1 = scmp.ne.s32.totalorder %s2848_s23, %s2049_s19  ;;  %p2057_p6 = scmp.lt.s32.totalorder %s2055_s13, %s2049_s19 }
 0x25e   : > { %v1226_v36 = vpop.permute.xlu1 %1225 }
 0x25f   : > { %v1282_v29 = vpack.c.bf16 %v1270_v31, %v1269_v26  ;;  %v1252_v21 = vmul.f32 %v1226_v36, %v1172_v2  ;;  %v1214_v2 = vmul.f32 %v1198_v4, %v2752_v7  ;;  %v1417_v4 = vld [vmem:[%s2292_s11 + $0x48] sm:$0xff]  ;;  %p2051_p2 = pnand %p2050_p1, %p2251_p3  ;;  %p2058_p7 = por %p2057_p6, %p2056_p5 }
 0x261   : > { %v1268_v62 = vadd.f32 %v1252_v21, %v1204_v35  ;;  %v1236_v37 = vpop.permute.xlu0 %1235  ;;  %p2052_p4 = pneg %p2051_p2 }
 0x262   : > { %v1257_v6 = vmul.f32 %v1236_v37, %v1177_v42  ;;  %v1408_v37 = vld [vmem:[%s2292_s11] sm:$0xff] }
 0x263   : > { %v1281_v41 = vpack.c.bf16 %v1268_v62, %v1267_v14  ;;  %v1410_v14 = vld [vmem:[%s2292_s11 + $0x10] sm:$0xff]  ;;  %p2059_p8 = pnand %p2058_p7, %p2052_p4 }
 0x264   : > { %v1273_v51 = vadd.f32 %v1257_v6, %v1209_v47 }
 0x265   : > { %1297 = vxpose.xlu0.c.b16.cont [3/8] %v1281_v41, 128  ;;  %v1232_v20 = vpop.permute.xlu0 %1231  ;;  %v1238_v50 = vpop.permute.xlu1 %1237 }
 0x266   : > { %v1258_v56 = vmul.f32 %v1238_v50, %v1178_v46  ;;  %v1255_v45 = vmul.f32 %v1232_v20, %v1175_v40  ;;  %v1409_v50 = vld [vmem:[%s2292_s11 + $0x8] sm:$0xff] }
 0x268   : > { %v1274_v59 = vadd.f32 %v1258_v56, %v1210_v24  ;;  %v1271_v27 = vadd.f32 %v1255_v45, %v1207_v60  ;;  %v1412_v45 = vld [vmem:[%s2292_s11 + $0x20] sm:$0xff] }
 0x269   : > { %1298 = vxpose.xlu0.c.b16.cont [4/8] %v1282_v29, 128  ;;  %v1234_v52 = vpop.permute.xlu1 %1233 }
 0x26a   : > { %v1284_v49 = vpack.c.bf16 %v1274_v59, %v1273_v51  ;;  %v1256_v43 = vmul.f32 %v1234_v52, %v1176_v18 }
 0x26b   : > { %v1240_v10 = vpop.permute.xlu0 %1239 }
 0x26c   : > { %v1272_v57 = vadd.f32 %v1256_v43, %v1208_v44  ;;  %v1259_v1 = vmul.f32 %v1240_v10, %v1179_v16 }
 0x26e   : > { %v1283_v55 = vpack.c.bf16 %v1272_v57, %v1271_v27  ;;  %v1275_v8 = vadd.f32 %v1259_v1, %v1211_v3  ;;  %v1413_v27 = vld [vmem:[%s2292_s11 + $0x28] sm:$0xff] }
 0x26f   : > { %v1244_v13 = vpop.permute.xlu0 %1243 }
 0x270   : > { %1299 = vxpose.xlu0.c.b16.cont [5/8] %v1283_v55, 128  ;;  %v1261_v0 = vmul.f32 %v1244_v13, %v1181_v53  ;;  %v1416_v53 = vld [vmem:[%s2292_s11 + $0x40] sm:$0xff] }
 0x271   : > { %v1242_v17 = vpop.permute.xlu1 %1241 }
 0x272   : > { %v1260_v61 = vmul.f32 %v1242_v17, %v1180_v48  ;;  %v1277_v26 = vadd.f32 %v1261_v0, %v1213_v30 }
 0x274   : > { %v1276_v11 = vadd.f32 %v1260_v61, %v1212_v38  ;;  %1300 = vxpose.xlu0.c.b16.cont [6/8] %v1284_v49, 128  ;;  %v1415_v49 = vld [vmem:[%s2292_s11 + $0x38] sm:$0xff] }
 0x275   : > { %v1246_v25 = vpop.permute.xlu1 %1245  ;;  %v1419_v38 = vld [vmem:[%s2292_s11 + $0x58] sm:$0xff] }
 0x276   : > { %v1285_v23 = vpack.c.bf16 %v1276_v11, %v1275_v8  ;;  %v1262_v34 = vmul.f32 %v1246_v25, %v1182_v19  ;;  %v1422_v25 = vld [vmem:[%s2292_s11 + $0x70] sm:$0xff] }
 0x278   : > { %v1278_v12 = vadd.f32 %v1262_v34, %v1214_v2  ;;  %1301 = vxpose.xlu0.c.b16.cont [7/8] %v1285_v23, 128  ;;  %v1420_v34 = vld [vmem:[%s2292_s11 + $0x60] sm:$0xff] }
 0x27a   : > { %v1286_v63 = vpack.c.bf16 %v1278_v12, %v1277_v26 }
 0x27c   : > { %1302 = vxpose.xlu0.c.b16.end [8/8] %v1286_v63, 128 }
 0x2c2   : > { %v1303_v9 = vpop.trf.xlu0 }
 0x2c3   : > { %1772 = vmatprep.mubr.bf16.mxu0 %v1303_v9  ;;  %v1423_v9 = vld [vmem:[%s2292_s11 + $0x78] sm:$0xff] }
 0x2c6   : > { %v1304_v31 = vpop.trf.xlu0 }
 0x2c7   : > { %1773 = vmatmul.mubr.bf16.vlgmr.msra.gmra.mxu0 %v1304_v31 }
 0x2ca   : > { %v1305_v36 = vpop.trf.xlu0 }
 0x2cb   : > { %1776 = vmatprep.mubr.bf16.mxu0 %v1305_v36 }
 0x2ce   : > { %v1306_v39 = vpop.trf.xlu0 }
 0x2cf   : > { %1777 = vmatmul.mubr.bf16.gmra.mxu0 %v1306_v39 }
 0x2d2   : > { %v1307_v28 = vpop.trf.xlu0 }
 0x2d3   : > { %1780 = vmatprep.mubr.bf16.mxu1 %v1307_v28  ;;  %v1421_v28 = vld [vmem:[%s2292_s11 + $0x68] sm:$0xff] }
 0x2d6   : > { %v1308_v7 = vpop.trf.xlu0 }
 0x2d7   : > { %1781 = vmatmul.mubr.bf16.vlgmr.msra.gmra.mxu1 %v1308_v7 }
 0x2da   : > { %v1309_v29 = vpop.trf.xlu0 }
 0x2db   : > { %1784 = vmatprep.mubr.bf16.mxu1 %v1309_v29 }
 0x2de   : > { %v1310_v35 = vpop.trf.xlu0 }
 0x2df   : > { %1785 = vmatmul.mubr.bf16.gmra.mxu1 %v1310_v35 }
 0x387   : > { %v1774_v21 = vpop.f32.mrf.mxu0 }
 0x388   : > { %v1426_v62 = vmul.f32 0.0625, %v1774_v21 }
 0x389   : > { %v1345_v42 = vpop.f32.mrf.mxu0 }
 0x38a   : > { %v1442_v41 = vadd.f32 %v1426_v62, %v1410_v14  ;;  %v1424_v33 = vmul.f32 0.0625, %v1345_v42 }
 0x38b   : > { %v1775_v46 = vpop.f32.mrf.mxu0 }
 0x38c   : > { %1458 = vst [vmem:[%s2292_s11 + $0x10] sm:$0xff] %v1442_v41  ;;  %v1440_v6 = vadd.f32 %v1424_v33, %v1408_v37  ;;  %v1427_v40 = vmul.f32 0.0625, %v1775_v46 }
 0x38d   : > { %v1348_v20 = vpop.f32.mrf.mxu0 }
 0x38e   : > { %1456 = vst [vmem:[%s2292_s11] sm:$0xff] %v1440_v6  ;;  %v1443_v47 = vadd.f32 %v1427_v40, %v1411_v54  ;;  %v1425_v24 = vmul.f32 0.0625, %v1348_v20 }
 0x38f   : > { %v1778_v56 = vpop.f32.mrf.mxu0 }
 0x390   : > { %1459 = vst [vmem:[%s2292_s11 + $0x18] sm:$0xff] %v1443_v47  ;;  %v1441_v18 = vadd.f32 %v1425_v24, %v1409_v50  ;;  %v1430_v5 = vmul.f32 0.0625, %v1778_v56 }
 0x391   : > { %v1361_v51 = vpop.f32.mrf.mxu0 }
 0x392   : > { %1457 = vst [vmem:[%s2292_s11 + $0x8] sm:$0xff] %v1441_v18  ;;  %v1446_v59 = vadd.f32 %v1430_v5, %v1414_v22  ;;  %v1428_v52 = vmul.f32 0.0625, %v1361_v51 }
 0x393   : > { %v1779_v60 = vpop.f32.mrf.mxu0 }
 0x394   : > { %1462 = vst [vmem:[%s2292_s11 + $0x30] sm:$0xff] %v1446_v59  ;;  %v1444_v44 = vadd.f32 %v1428_v52, %v1412_v45  ;;  %v1431_v43 = vmul.f32 0.0625, %v1779_v60 }
 0x395   : > { %v1364_v10 = vpop.f32.mrf.mxu0 }
 0x396   : > { %1460 = vst [vmem:[%s2292_s11 + $0x20] sm:$0xff] %v1444_v44  ;;  %v1447_v57 = vadd.f32 %v1431_v43, %v1415_v49  ;;  %v1429_v16 = vmul.f32 0.0625, %v1364_v10 }
 0x397   : > { %v1782_v55 = vpop.f32.mrf.mxu1 }
 0x398   : > { %1463 = vst [vmem:[%s2292_s11 + $0x38] sm:$0xff] %v1447_v57  ;;  %v1445_v48 = vadd.f32 %v1429_v16, %v1413_v27  ;;  %v1434_v15 = vmul.f32 0.0625, %v1782_v55 }
 0x399   : > { %v1377_v1 = vpop.f32.mrf.mxu1 }
 0x39a   : > { %1461 = vst [vmem:[%s2292_s11 + $0x28] sm:$0xff] %v1445_v48  ;;  %v1450_v13 = vadd.f32 %v1434_v15, %v1418_v58  ;;  %v1432_v17 = vmul.f32 0.0625, %v1377_v1 }
 0x39b   : > { %v1783_v3 = vpop.f32.mrf.mxu1 }
 0x39c   : > { %1466 = vst [vmem:[%s2292_s11 + $0x50] sm:$0xff] %v1450_v13  ;;  %v1448_v61 = vadd.f32 %v1432_v17, %v1416_v53  ;;  %v1435_v32 = vmul.f32 0.0625, %v1783_v3 }
 0x39d   : > { %v1380_v19 = vpop.f32.mrf.mxu1 }
 0x39e   : > { %1464 = vst [vmem:[%s2292_s11 + $0x40] sm:$0xff] %v1448_v61  ;;  %v1451_v8 = vadd.f32 %v1435_v32, %v1419_v38  ;;  %v1433_v0 = vmul.f32 0.0625, %v1380_v19 }
 0x39f   : > { %v1786_v11 = vpop.f32.mrf.mxu1 }
 0x3a0   : > { %1467 = vst [vmem:[%s2292_s11 + $0x58] sm:$0xff] %v1451_v8  ;;  %v1449_v30 = vadd.f32 %v1433_v0, %v1417_v4  ;;  %v1438_v23 = vmul.f32 0.0625, %v1786_v11 }
 0x3a1   : > { %v1393_v2 = vpop.f32.mrf.mxu1 }
 0x3a2   : > { %1465 = vst [vmem:[%s2292_s11 + $0x48] sm:$0xff] %v1449_v30  ;;  %v1454_v26 = vadd.f32 %v1438_v23, %v1422_v25  ;;  %v1436_v12 = vmul.f32 0.0625, %v1393_v2 }
 0x3a3   : > { %v1787_v63 = vpop.f32.mrf.mxu1 }
 0x3a4   : > { %1470 = vst [vmem:[%s2292_s11 + $0x70] sm:$0xff] %v1454_v26  ;;  %v1452_v31 = vadd.f32 %v1436_v12, %v1420_v34  ;;  %v1439_v36 = vmul.f32 0.0625, %v1787_v63 }
 0x3a5   : > { %v1396_v39 = vpop.f32.mrf.mxu1 }
 0x3a6   : > { %1468 = vst [vmem:[%s2292_s11 + $0x60] sm:$0xff] %v1452_v31  ;;  %v1455_v7 = vadd.f32 %v1439_v36, %v1423_v9  ;;  %v1437_v29 = vmul.f32 0.0625, %v1396_v39 }
 0x3a8   : > { %1471 = vst [vmem:[%s2292_s11 + $0x78] sm:$0xff] %v1455_v7  ;;  %v1453_v35 = vadd.f32 %v1437_v29, %v1421_v28 }
 0x3aa   : > { %1469 = vst [vmem:[%s2292_s11 + $0x68] sm:$0xff] %v1453_v35 }
 0x3ab   : > { %2062 = shalt.err (!%p2059_p8)
}
 0x3ac   : > { %s2063_s11 = scalar_lea.hbm %s2846_s10, 2048  ;;  %s2067_s17 = scalar_lea.hbm %s2914_s9, 4096 }
 0x3ad   : > { %p2064_p10 = scmp.ne.s32.totalorder %s2846_s10, %s2063_s11  ;;  %p2068_p13 = scmp.lt.s32.totalorder %s2846_s10, %s2914_s9 }
 0x3ae   : > { %p2069_p0 = scmp.lt.s32.totalorder %s2067_s17, %s2063_s11 }
 0x3af   : > { %p2065_p11 = pnand %p2064_p10, %p2251_p3 }
 0x3b0   : > { %p2070_p1 = por %p2069_p0, %p2068_p13 }
 0x3b1   : > { %p2066_p12 = pneg %p2065_p11 }
 0x3b3   : > { %p2071_p2 = pnand %p2070_p1, %p2066_p12 }
 0x3b5   : > { %2074 = shalt.err (!%p2071_p2)
}
 0x3b6   : > { %s2147_s27 = smov 128   ;;  %s2148_s28 = smov 8  }
 0x3b7   : > { %1804 = dma.vmem_to_hbm [thread:$0]  (%p2251_p3), %s2848_s23, 2048, %s2846_s10, %s2854_s1, %s2147_s27, %s2147_s27, %s2148_s28  }
 0x3b8 PF: > { %s2933_s20 = sld [smem:[#allocation6_spill]]  ;;  %p1810_p4 = scmp.ge.s32.totalorder %s2141_s18, 2 }
 0x3ba   : > { %p1807_p5 = pnand %p1810_p4, %p2261_p9 }
 0x3bc   : > { %p1808_p6 = pneg %p1807_p5 }
 0x3be   : > { %s1501_s30 = sand.u32 1, %s2933_s20  }
 0x3bf   : > { %s1502_s15 = scalar_lea.sflag [#allocation4], %s1501_s30 }
 0x3c0   : > { %2108 = dma.done.wait (%p1808_p6), %s1502_s15, 2048  }
 0x3c1   : > { %2110 = vsyncadd (%p1808_p6), %s1502_s15, 4294965248  ;;  %s24_s18 = sadd.s32 1, %s2141_s18   ;;  %s2935_s19 = sld [smem:[#allocation7_spill]] }
 0x3c2   : > { %p21_p7 = scmp.ge.s32.totalorder %s24_s18, 6   ;;  %s2936_s13 = sld [smem:[#allocation13_spill]] }
 0x3c3   : > { %s2937_s14 = sld [smem:[#allocation8_spill]]  ;;  %s2941_s11 = smov %s2117_s12 }
 0x3c4   : > { %s2938_s15 = sld [smem:[#allocation9_spill]]  ;;  %23 = sbr.rel (!%p21_p7) target bundleno = 8 (0x8), region = 101 }
 0x3c5   : > { %s2939_s16 = sld [smem:[#allocation10_spill]] }
 0x3c6   : > { %s2940_s17 = sld [smem:[#allocation11_spill]] }
 0x3c7   : > { %s2942_s12 = smov %s2935_s19 }
 0x3c9   :  { %1507 = vsyncpa [#allocation4], 1 }
 0x3ca   :  { %1509 = vsyncpa [#allocation4 + $0x1], 1 }

</bundles_post_ra>
